<compile_context>
chip_gen: v7x
topology: tpu7x:2x2x1
jax: 0.10.0
libtpu: 0.0.40
codegen_flags: <defaults>
</compile_context>

<pallas_src>
import jax
import jax.numpy as jnp
import numpy as np
from jax.experimental import pallas as pl
from jax.experimental.pallas import tpu as pltpu

# ---- small, module-consistent shapes ----
B, S, D = 2, 8, 32          # batch, seq, embed_dim
BS = B * S                  # flattened token count
H = 8                       # num_heads  (dim % num_heads == 0)
HD = D // H                 # head dim
HBS = H * BS
D8 = D // 8                 # channel_attn bottleneck
MLP_H = D * 4               # mlp_ratio = 4
EPS = 1e-5                  # nn.LayerNorm default eps
SQRT2 = 1.4142135623730951


def _layernorm(v, g, b):
    mu = jnp.mean(v, axis=-1, keepdims=True)
    var = jnp.mean((v - mu) ** 2, axis=-1, keepdims=True)
    return (v - mu) * jax.lax.rsqrt(var + EPS) * g + b


def _build_constants():
    """Compile-time constants (built once with numpy, passed as operands)."""
    # head mask: row r (= head h, token i with r = h*BS + i) keeps only channels of head h
    hm = np.zeros((HBS, D), np.float32)
    for h in range(H):
        hm[h * BS:(h + 1) * BS, h * HD:(h + 1) * HD] = 1.0
    # block-diagonal batch bias (no cross-batch attention), tiled over heads
    rb = np.arange(BS)[:, None] // S
    cb = np.arange(BS)[None, :] // S
    bblk = np.where(rb == cb, 0.0, -1e30).astype(np.float32)       # (BS, BS)
    bblk_tiled = np.tile(bblk, (H, 1))                             # (HBS, BS)
    # channel-gate selector: gate[i] = cw[2*(i//S)] + cw[2*(i//S)+1]  (avg + max branch)
    gsel = np.zeros((BS, 2 * B), np.float32)
    for i in range(BS):
        gsel[i, 2 * (i // S)] = 1.0
        gsel[i, 2 * (i // S) + 1] = 1.0
    return (jnp.asarray(hm, jnp.bfloat16),
            jnp.asarray(bblk_tiled, jnp.float32),
            jnp.asarray(gsel, jnp.bfloat16))


_HEAD_MASK, _BATCH_BIAS, _GATE_SEL = _build_constants()


def transformer_block_kernel(
    # inputs
    x_ref,                      # (BS, D)   f32
    hmask_ref,                  # (HBS, D)  bf16 constant {0,1}
    bblk_ref,                   # (HBS, BS) f32 constant {0,-1e30}
    gsel_ref,                   # (BS, 2B)  bf16 constant {0,1}
    wqkv_ref,                   # (D, 3D)   bf16
    opw_ref,                    # (D, D)    bf16
    ca1w_ref,                   # (D, D8)   bf16
    ca2w_ref,                   # (D8, D)   bf16
    f1w_ref,                    # (D, MLP_H)  bf16
    f2w_ref,                    # (MLP_H, D)  bf16
    bias_ref,                   # (11, 128) f32 packed bias/gain rows
    scal_ref,                   # (4,)      f32 SMEM: [w0, w1, w2, spatial_bias]
    # output
    o_ref,                      # (BS, D)   f32
):
    x = x_ref[...]                                           # (BS, D) f32

    # ---- unpack the packed bias/gain slab (static slices) ----
    ln1_g = bias_ref[0:1, 0:D]
    ln1_b = bias_ref[1:2, 0:D]
    bqkv = bias_ref[2:3, 0:3 * D]
    opb = bias_ref[3:4, 0:D]
    ca1b = bias_ref[4:5, 0:D8]
    ca2b = bias_ref[5:6, 0:D]
    saw = bias_ref[6:7, 0:D]
    ln2_g = bias_ref[7:8, 0:D]
    ln2_b = bias_ref[8:9, 0:D]
    f1b = bias_ref[9:10, 0:MLP_H]
    f2b = bias_ref[10:11, 0:D]

    # ---- norm1 ----
    xn = _layernorm(x, ln1_g, ln1_b)                         # (BS, D) f32
    xn_bf = xn.astype(jnp.bfloat16)

    # ---- fused QKV projection (bf16 MXU inputs, f32 accumulation) ----
    qkv = jnp.dot(xn_bf, wqkv_ref[...],
                  preferred_element_type=jnp.float32) + bqkv  # (BS, 3D) f32
    q = qkv[:, 0:D]
    k = qkv[:, D:2 * D]
    v = qkv[:, 2 * D:3 * D]

    # ---- MultiheadAttention via head-masked single score matmul ----
    head_mask = hmask_ref[...]                               # (HBS, D) bf16
    q_rep = jnp.concatenate([q.astype(jnp.bfloat16)] * H, axis=0)   # (HBS, D) bf16
    qm = q_rep * head_mask                                   # zero out other heads' channels

    scale = 1.0 / (HD ** 0.5)
    scores = jax.lax.dot_general(
        qm, k.astype(jnp.bfloat16),
        dimension_numbers=(((1,), (1,)), ((), ())),
        preferred_element_type=jnp.float32) * scale          # (HBS, BS) f32
    scores = scores + bblk_ref[...]                          # batch mask in f32 (bf16-safe)

    scores = scores - jnp.max(scores, axis=-1, keepdims=True)
    p = jnp.exp(scores)
    p = p * pl.reciprocal(jnp.sum(p, axis=-1, keepdims=True), approx=True)

    ov = jnp.dot(p.astype(jnp.bfloat16), v.astype(jnp.bfloat16),
                 preferred_element_type=jnp.float32)         # (HBS, D) f32
    ov = ov * head_mask.astype(jnp.float32)                  # keep only each head's block

    # depth-3 pairwise head reduction (was a 7-long serial chain)
    a0 = ov[0 * BS:1 * BS] + ov[1 * BS:2 * BS]
    a1 = ov[2 * BS:3 * BS] + ov[3 * BS:4 * BS]
    a2 = ov[4 * BS:5 * BS] + ov[5 * BS:6 * BS]
    a3 = ov[6 * BS:7 * BS] + ov[7 * BS:8 * BS]
    attn = (a0 + a1) + (a2 + a3)                             # (BS, D) f32

    mha_out = jnp.dot(attn.astype(jnp.bfloat16), opw_ref[...],
                      preferred_element_type=jnp.float32) + opb      # (BS, D)

    # ---- channel attention: stack (avg, max) pools of both batches -> one pass ----
    pools = []
    for b in range(B):
        xb = xn[b * S:(b + 1) * S]                           # static (S, D) slice
        pools.append(jnp.mean(xb, axis=0, keepdims=True))
        pools.append(jnp.max(xb, axis=0, keepdims=True))
    pool_mat = jnp.concatenate(pools, axis=0).astype(jnp.bfloat16)   # (2B, D)
    h1 = jnp.maximum(
        jnp.dot(pool_mat, ca1w_ref[...], preferred_element_type=jnp.float32)
        + ca1b, 0.0)                                         # (2B, D8)
    cw = jax.nn.sigmoid(
        jnp.dot(h1.astype(jnp.bfloat16), ca2w_ref[...],
                preferred_element_type=jnp.float32) + ca2b)  # (2B, D)
    # gate[i] = cw[avg, batch(i)] + cw[max, batch(i)] via constant selector matmul
    gate = jnp.dot(gsel_ref[...], cw.astype(jnp.bfloat16),
                   preferred_element_type=jnp.float32)       # (BS, D)
    channel_out = xn * gate

    # ---- spatial attention (row-wise reduction instead of a (*,1) matmul) ----
    sab = scal_ref[3]
    spatial_weights = jax.nn.sigmoid(
        jnp.sum(xn * saw, axis=-1, keepdims=True) + sab)     # (BS, 1)
    spatial_out = xn * spatial_weights

    # ---- weighted combination + residual ----
    x1 = (x + scal_ref[0] * mha_out + scal_ref[1] * channel_out
          + scal_ref[2] * spatial_out)

    # ---- norm2 + MLP + residual ----
    x2n = _layernorm(x1, ln2_g, ln2_b)
    hmid = jnp.dot(x2n.astype(jnp.bfloat16), f1w_ref[...],
                   preferred_element_type=jnp.float32) + f1b          # (BS, MLP_H)
    hmid = 0.5 * hmid * (1.0 + jax.lax.erf(hmid * (1.0 / SQRT2)))     # exact GELU, f32
    m = jnp.dot(hmid.astype(jnp.bfloat16), f2w_ref[...],
                preferred_element_type=jnp.float32) + f2b             # (BS, D)

    o_ref[...] = (x1 + m).astype(o_ref.dtype)


def _pad_row(v, width=MLP_H):
    v = jnp.asarray(v, jnp.float32).reshape(-1)
    return jnp.pad(v, (0, width - v.shape[0]))[None, :]


def transformer_block(x, p):
    """x: (B, S, D) f32.  p: dict of parameters (see init_params)."""
    xf = x.reshape(BS, D)                                    # free wrapper-side reshape

    # packed SMEM scalars: softmaxed bag weights + spatial-attn bias
    scalars = jnp.concatenate(
        [jax.nn.softmax(p["bag_w"]).astype(jnp.float32),
         p["sab"].astype(jnp.float32)], axis=0)              # (4,)

    # packed VMEM bias/gain slab (one DMA instead of ~12)
    bias_slab = jnp.concatenate([
        _pad_row(p["ln1_g"]), _pad_row(p["ln1_b"]),
        _pad_row(p["ipb"]),                                  # fused qkv bias (96,)
        _pad_row(p["opb"]),
        _pad_row(p["ca1b"]), _pad_row(p["ca2b"]),
        _pad_row(p["saw"]),                                  # spatial weight row (32,)
        _pad_row(p["ln2_g"]), _pad_row(p["ln2_b"]),
        _pad_row(p["f1b"]), _pad_row(p["f2b"]),
    ], axis=0)                                               # (11, 128) f32

    bf = jnp.bfloat16
    operands = [
        xf,
        _HEAD_MASK, _BATCH_BIAS, _GATE_SEL,
        p["ipw"].T.astype(bf),                               # (D, 3D) fused QKV weight
        p["opw"].T.astype(bf),
        p["ca1w"].T.astype(bf), p["ca2w"].T.astype(bf),
        p["f1w"].T.astype(bf), p["f2w"].T.astype(bf),
        bias_slab,
        scalars,
    ]

    vmem = pl.BlockSpec(memory_space=pltpu.MemorySpace.VMEM)
    smem = pl.BlockSpec(memory_space=pltpu.MemorySpace.SMEM)
    in_specs = [vmem] * (len(operands) - 1) + [smem]         # scalars -> SMEM

    out = pl.pallas_call(
        transformer_block_kernel,
        out_shape=jax.ShapeDtypeStruct((BS, D), jnp.float32),
        in_specs=in_specs,
        out_specs=pl.BlockSpec(memory_space=pltpu.MemorySpace.VMEM),
    )(*operands)
    return out.reshape(B, S, D)


def init_params(key):
    ks = jax.random.split(key, 16)
    n = lambda k, shape, s=0.1: (s * jax.random.normal(k, shape)).astype(jnp.float32)
    p = {
        # norm1 / norm2 (PyTorch default init: weight=1, bias=0)
        "ln1_g": jnp.ones((D,), jnp.float32), "ln1_b": jnp.zeros((D,), jnp.float32),
        "ln2_g": jnp.ones((D,), jnp.float32), "ln2_b": jnp.zeros((D,), jnp.float32),
        # MultiheadAttention
        "ipw": n(ks[0], (3 * D, D)), "ipb": n(ks[1], (3 * D,), 0.02),
        "opw": n(ks[2], (D, D)),     "opb": n(ks[3], (D,), 0.02),
        # channel_attn: Linear(D, D//8) -> ReLU -> Linear(D//8, D) -> Sigmoid
        "ca1w": n(ks[4], (D8, D)), "ca1b": n(ks[5], (D8,), 0.02),
        "ca2w": n(ks[6], (D, D8)), "ca2b": n(ks[7], (D,), 0.02),
        # spatial_attn: Linear(D, 1) -> Sigmoid
        "saw": n(ks[8], (1, D)), "sab": n(ks[9], (1,), 0.02),
        # bag weights (torch init: ones(3))
        "bag_w": jnp.ones((3,), jnp.float32),
        # MLP
        "f1w": n(ks[10], (MLP_H, D)), "f1b": n(ks[11], (MLP_H,), 0.02),
        "f2w": n(ks[12], (D, MLP_H)), "f2b": n(ks[13], (D,), 0.02),
    }
    return p


def reference(x, p):
    """Pure-JAX reference of the PyTorch forward (eval mode)."""
    def ln(v, g, b):
        mu = v.mean(-1, keepdims=True)
        var = ((v - mu) ** 2).mean(-1, keepdims=True)
        return (v - mu) / jnp.sqrt(var + EPS) * g + b

    xn = ln(x, p["ln1_g"], p["ln1_b"])
    qkv = xn @ p["ipw"].T + p["ipb"]
    q, k, v = jnp.split(qkv, 3, axis=-1)
    qh = q.reshape(B, S, H, HD).transpose(0, 2, 1, 3)
    kh = k.reshape(B, S, H, HD).transpose(0, 2, 1, 3)
    vh = v.reshape(B, S, H, HD).transpose(0, 2, 1, 3)
    scores = (qh @ kh.transpose(0, 1, 3, 2)) / (HD ** 0.5)
    a = jax.nn.softmax(scores, axis=-1)
    o = (a @ vh).transpose(0, 2, 1, 3).reshape(B, S, D)
    mha = o @ p["opw"].T + p["opb"]

    avg = xn.mean(1)
    mx = xn.max(1)

    def cattn(t):
        h1 = jnp.maximum(t @ p["ca1w"].T + p["ca1b"], 0.0)
        return jax.nn.sigmoid(h1 @ p["ca2w"].T + p["ca2b"])

    cw = (cattn(avg) + cattn(mx))[:, None, :]
    ch_out = xn * cw
    sw = jax.nn.sigmoid(xn @ p["saw"].T + p["sab"])
    sp_out = xn * sw
    w = jax.nn.softmax(p["bag_w"])
    combined = w[0] * mha + w[1] * ch_out + w[2] * sp_out
    x1 = x + combined

    x2n = ln(x1, p["ln2_g"], p["ln2_b"])
    hmid = x2n @ p["f1w"].T + p["f1b"]
    hmid = 0.5 * hmid * (1.0 + jax.lax.erf(hmid / SQRT2))
    m = hmid @ p["f2w"].T + p["f2b"]
    return x1 + m


if __name__ == "__main__":
    key = jax.random.PRNGKey(0)
    kx, kp = jax.random.split(key)
    x = jax.random.normal(kx, (B, S, D), dtype=jnp.float32)
    params = init_params(kp)

    out = transformer_block(x, params)
    out = jax.block_until_ready(out)

    ref = jax.block_until_ready(reference(x, params))
    np.testing.assert_allclose(np.asarray(out), np.asarray(ref),
                               rtol=2e-2, atol=2e-2)
    print("KERNEL_OK")
</pallas_src>

<mosaic_0001>
module attributes {stable_mosaic.version = 11 : i64} {
  func.func @transformer_block_kernel(%arg0: memref<16x32xf32, #tpu.memory_space<vmem>>, %arg1: memref<128x32xbf16, #tpu.memory_space<vmem>>, %arg2: memref<128x16xf32, #tpu.memory_space<vmem>>, %arg3: memref<16x4xbf16, #tpu.memory_space<vmem>>, %arg4: memref<32x96xbf16, #tpu.memory_space<vmem>>, %arg5: memref<32x32xbf16, #tpu.memory_space<vmem>>, %arg6: memref<32x4xbf16, #tpu.memory_space<vmem>>, %arg7: memref<4x32xbf16, #tpu.memory_space<vmem>>, %arg8: memref<32x128xbf16, #tpu.memory_space<vmem>>, %arg9: memref<128x32xbf16, #tpu.memory_space<vmem>>, %arg10: memref<11x128xf32, #tpu.memory_space<vmem>>, %arg11: memref<4xf32, #tpu.memory_space<smem>>, %arg12: memref<16x32xf32, #tpu.memory_space<vmem>>) attributes {dimension_semantics = [], scalar_prefetch = 0 : i64, scratch_operands = 0 : i64, tpu.core_type = #tpu.core_type<tc>} {
    %c0 = arith.constant 0 : index
    %c0_0 = arith.constant 0 : index
    %0 = vector.load %arg0[%c0, %c0_0] : memref<16x32xf32, #tpu.memory_space<vmem>>, vector<16x32xf32>
    %c0_1 = arith.constant 0 : index
    %c0_2 = arith.constant 0 : index
    %1 = vector.load %arg10[%c0_1, %c0_2] : memref<11x128xf32, #tpu.memory_space<vmem>>, vector<1x32xf32>
    %c1 = arith.constant 1 : index
    %c0_3 = arith.constant 0 : index
    %2 = vector.load %arg10[%c1, %c0_3] : memref<11x128xf32, #tpu.memory_space<vmem>>, vector<1x32xf32>
    %c2 = arith.constant 2 : index
    %c0_4 = arith.constant 0 : index
    %3 = vector.load %arg10[%c2, %c0_4] : memref<11x128xf32, #tpu.memory_space<vmem>>, vector<1x96xf32>
    %c3 = arith.constant 3 : index
    %c0_5 = arith.constant 0 : index
    %4 = vector.load %arg10[%c3, %c0_5] : memref<11x128xf32, #tpu.memory_space<vmem>>, vector<1x32xf32>
    %c4 = arith.constant 4 : index
    %c0_6 = arith.constant 0 : index
    %5 = vector.load %arg10[%c4, %c0_6] : memref<11x128xf32, #tpu.memory_space<vmem>>, vector<1x4xf32>
    %c5 = arith.constant 5 : index
    %c0_7 = arith.constant 0 : index
    %6 = vector.load %arg10[%c5, %c0_7] : memref<11x128xf32, #tpu.memory_space<vmem>>, vector<1x32xf32>
    %c6 = arith.constant 6 : index
    %c0_8 = arith.constant 0 : index
    %7 = vector.load %arg10[%c6, %c0_8] : memref<11x128xf32, #tpu.memory_space<vmem>>, vector<1x32xf32>
    %c7 = arith.constant 7 : index
    %c0_9 = arith.constant 0 : index
    %8 = vector.load %arg10[%c7, %c0_9] : memref<11x128xf32, #tpu.memory_space<vmem>>, vector<1x32xf32>
    %c8 = arith.constant 8 : index
    %c0_10 = arith.constant 0 : index
    %9 = vector.load %arg10[%c8, %c0_10] : memref<11x128xf32, #tpu.memory_space<vmem>>, vector<1x32xf32>
    %c9 = arith.constant 9 : index
    %c0_11 = arith.constant 0 : index
    %10 = vector.load %arg10[%c9, %c0_11] : memref<11x128xf32, #tpu.memory_space<vmem>>, vector<1x128xf32>
    %c10 = arith.constant 10 : index
    %c0_12 = arith.constant 0 : index
    %11 = vector.load %arg10[%c10, %c0_12] : memref<11x128xf32, #tpu.memory_space<vmem>>, vector<1x32xf32>
    %cst = arith.constant dense<0.000000e+00> : vector<16xf32>
    %12 = vector.multi_reduction <add>, %0, %cst [1] : vector<16x32xf32> to vector<16xf32>
    %13 = vector.shape_cast %12 : vector<16xf32> to vector<16x1xf32>
    %cst_13 = arith.constant 3.200000e+01 : f32
    %14 = vector.broadcast %cst_13 : f32 to vector<16x1xf32>
    %15 = arith.divf %13, %14 : vector<16x1xf32>
    %16 = vector.broadcast %15 : vector<16x1xf32> to vector<16x32xf32>
    %17 = arith.subf %0, %16 : vector<16x32xf32>
    %18 = arith.mulf %17, %17 : vector<16x32xf32>
    %cst_14 = arith.constant dense<0.000000e+00> : vector<16xf32>
    %19 = vector.multi_reduction <add>, %18, %cst_14 [1] : vector<16x32xf32> to vector<16xf32>
    %20 = vector.shape_cast %19 : vector<16xf32> to vector<16x1xf32>
    %cst_15 = arith.constant 3.200000e+01 : f32
    %21 = vector.broadcast %cst_15 : f32 to vector<16x1xf32>
    %22 = arith.divf %20, %21 : vector<16x1xf32>
    %23 = vector.broadcast %15 : vector<16x1xf32> to vector<16x32xf32>
    %24 = arith.subf %0, %23 : vector<16x32xf32>
    %cst_16 = arith.constant 9.99999974E-6 : f32
    %25 = vector.broadcast %cst_16 : f32 to vector<16x1xf32>
    %26 = arith.addf %22, %25 : vector<16x1xf32>
    %27 = math.rsqrt %26 : vector<16x1xf32>
    %28 = vector.broadcast %27 : vector<16x1xf32> to vector<16x32xf32>
    %29 = arith.mulf %24, %28 : vector<16x32xf32>
    %30 = vector.broadcast %1 : vector<1x32xf32> to vector<16x32xf32>
    %31 = arith.mulf %29, %30 : vector<16x32xf32>
    %32 = vector.broadcast %2 : vector<1x32xf32> to vector<16x32xf32>
    %33 = arith.addf %31, %32 : vector<16x32xf32>
    %34 = arith.truncf %33 : vector<16x32xf32> to vector<16x32xbf16>
    %c0_17 = arith.constant 0 : index
    %c0_18 = arith.constant 0 : index
    %35 = vector.load %arg4[%c0_17, %c0_18] : memref<32x96xbf16, #tpu.memory_space<vmem>>, vector<32x96xbf16>
    %cst_19 = arith.constant dense<0.000000e+00> : vector<16x96xf32>
    %36 = tpu.matmul %34, %35, %cst_19 {dimension_numbers = #tpu.dot_dimension_numbers<[1], [0], [0], [1], [0, 0, 1, 1], [], []>} : vector<16x32xbf16>, vector<32x96xbf16>, vector<16x96xf32> -> vector<16x96xf32>
    %37 = vector.broadcast %3 : vector<1x96xf32> to vector<16x96xf32>
    %38 = arith.addf %36, %37 : vector<16x96xf32>
    %39 = vector.extract_strided_slice %38 {offsets = [0, 0], sizes = [16, 32], strides = [1, 1]} : vector<16x96xf32> to vector<16x32xf32>
    %40 = vector.extract_strided_slice %38 {offsets = [0, 32], sizes = [16, 32], strides = [1, 1]} : vector<16x96xf32> to vector<16x32xf32>
    %41 = vector.extract_strided_slice %38 {offsets = [0, 64], sizes = [16, 32], strides = [1, 1]} : vector<16x96xf32> to vector<16x32xf32>
    %c0_20 = arith.constant 0 : index
    %c0_21 = arith.constant 0 : index
    %42 = vector.load %arg1[%c0_20, %c0_21] : memref<128x32xbf16, #tpu.memory_space<vmem>>, vector<128x32xbf16>
    %43 = arith.truncf %39 : vector<16x32xf32> to vector<16x32xbf16>
    %44 = tpu.concatenate %43, %43, %43, %43, %43, %43, %43, %43 in 0 : vector<16x32xbf16>, vector<16x32xbf16>, vector<16x32xbf16>, vector<16x32xbf16>, vector<16x32xbf16>, vector<16x32xbf16>, vector<16x32xbf16>, vector<16x32xbf16> -> vector<128x32xbf16>
    %45 = arith.mulf %44, %42 : vector<128x32xbf16>
    %46 = arith.truncf %40 : vector<16x32xf32> to vector<16x32xbf16>
    %cst_22 = arith.constant dense<0.000000e+00> : vector<128x16xf32>
    %47 = tpu.matmul %45, %46, %cst_22 {dimension_numbers = #tpu.dot_dimension_numbers<[1], [1], [0], [0], [0, 0, 1, 0], [], []>} : vector<128x32xbf16>, vector<16x32xbf16>, vector<128x16xf32> -> vector<128x16xf32>
    %cst_23 = arith.constant 5.000000e-01 : f32
    %48 = vector.broadcast %cst_23 : f32 to vector<128x16xf32>
    %49 = arith.mulf %47, %48 : vector<128x16xf32>
    %c0_24 = arith.constant 0 : index
    %c0_25 = arith.constant 0 : index
    %50 = vector.load %arg2[%c0_24, %c0_25] : memref<128x16xf32, #tpu.memory_space<vmem>>, vector<128x16xf32>
    %51 = arith.addf %49, %50 : vector<128x16xf32>
    %cst_26 = arith.constant dense<0xFF800000> : vector<128xf32>
    %52 = vector.multi_reduction <maximumf>, %51, %cst_26 [1] : vector<128x16xf32> to vector<128xf32>
    %53 = vector.shape_cast %52 : vector<128xf32> to vector<128x1xf32>
    %54 = vector.broadcast %53 : vector<128x1xf32> to vector<128x16xf32>
    %55 = arith.subf %51, %54 : vector<128x16xf32>
    %56 = math.exp %55 : vector<128x16xf32>
    %cst_27 = arith.constant dense<0.000000e+00> : vector<128xf32>
    %57 = vector.multi_reduction <add>, %56, %cst_27 [1] : vector<128x16xf32> to vector<128xf32>
    %58 = vector.shape_cast %57 : vector<128xf32> to vector<128x1xf32>
    %59 = tpu.reciprocal %58 {approx = true} : vector<128x1xf32> -> vector<128x1xf32>
    %60 = vector.broadcast %59 : vector<128x1xf32> to vector<128x16xf32>
    %61 = arith.mulf %56, %60 : vector<128x16xf32>
    %62 = arith.truncf %61 : vector<128x16xf32> to vector<128x16xbf16>
    %63 = arith.truncf %41 : vector<16x32xf32> to vector<16x32xbf16>
    %cst_28 = arith.constant dense<0.000000e+00> : vector<128x32xf32>
    %64 = tpu.matmul %62, %63, %cst_28 {dimension_numbers = #tpu.dot_dimension_numbers<[1], [0], [0], [1], [0, 0, 1, 1], [], []>} : vector<128x16xbf16>, vector<16x32xbf16>, vector<128x32xf32> -> vector<128x32xf32>
    %65 = arith.extf %42 : vector<128x32xbf16> to vector<128x32xf32>
    %66 = arith.mulf %64, %65 : vector<128x32xf32>
    %67 = vector.extract_strided_slice %66 {offsets = [0, 0], sizes = [16, 32], strides = [1, 1]} : vector<128x32xf32> to vector<16x32xf32>
    %68 = vector.extract_strided_slice %66 {offsets = [16, 0], sizes = [16, 32], strides = [1, 1]} : vector<128x32xf32> to vector<16x32xf32>
    %69 = arith.addf %67, %68 : vector<16x32xf32>
    %70 = vector.extract_strided_slice %66 {offsets = [32, 0], sizes = [16, 32], strides = [1, 1]} : vector<128x32xf32> to vector<16x32xf32>
    %71 = vector.extract_strided_slice %66 {offsets = [48, 0], sizes = [16, 32], strides = [1, 1]} : vector<128x32xf32> to vector<16x32xf32>
    %72 = arith.addf %70, %71 : vector<16x32xf32>
    %73 = vector.extract_strided_slice %66 {offsets = [64, 0], sizes = [16, 32], strides = [1, 1]} : vector<128x32xf32> to vector<16x32xf32>
    %74 = vector.extract_strided_slice %66 {offsets = [80, 0], sizes = [16, 32], strides = [1, 1]} : vector<128x32xf32> to vector<16x32xf32>
    %75 = arith.addf %73, %74 : vector<16x32xf32>
    %76 = vector.extract_strided_slice %66 {offsets = [96, 0], sizes = [16, 32], strides = [1, 1]} : vector<128x32xf32> to vector<16x32xf32>
    %77 = vector.extract_strided_slice %66 {offsets = [112, 0], sizes = [16, 32], strides = [1, 1]} : vector<128x32xf32> to vector<16x32xf32>
    %78 = arith.addf %76, %77 : vector<16x32xf32>
    %79 = arith.addf %69, %72 : vector<16x32xf32>
    %80 = arith.addf %75, %78 : vector<16x32xf32>
    %81 = arith.addf %79, %80 : vector<16x32xf32>
    %82 = arith.truncf %81 : vector<16x32xf32> to vector<16x32xbf16>
    %c0_29 = arith.constant 0 : index
    %c0_30 = arith.constant 0 : index
    %83 = vector.load %arg5[%c0_29, %c0_30] : memref<32x32xbf16, #tpu.memory_space<vmem>>, vector<32x32xbf16>
    %cst_31 = arith.constant dense<0.000000e+00> : vector<16x32xf32>
    %84 = tpu.matmul %82, %83, %cst_31 {dimension_numbers = #tpu.dot_dimension_numbers<[1], [0], [0], [1], [0, 0, 1, 1], [], []>} : vector<16x32xbf16>, vector<32x32xbf16>, vector<16x32xf32> -> vector<16x32xf32>
    %85 = vector.broadcast %4 : vector<1x32xf32> to vector<16x32xf32>
    %86 = arith.addf %84, %85 : vector<16x32xf32>
    %87 = vector.extract_strided_slice %33 {offsets = [0, 0], sizes = [8, 32], strides = [1, 1]} : vector<16x32xf32> to vector<8x32xf32>
    %cst_32 = arith.constant dense<0.000000e+00> : vector<32xf32>
    %88 = vector.multi_reduction <add>, %87, %cst_32 [0] : vector<8x32xf32> to vector<32xf32>
    %89 = vector.shape_cast %88 : vector<32xf32> to vector<1x32xf32>
    %cst_33 = arith.constant 8.000000e+00 : f32
    %90 = vector.broadcast %cst_33 : f32 to vector<1x32xf32>
    %91 = arith.divf %89, %90 : vector<1x32xf32>
    %cst_34 = arith.constant dense<0xFF800000> : vector<32xf32>
    %92 = vector.multi_reduction <maximumf>, %87, %cst_34 [0] : vector<8x32xf32> to vector<32xf32>
    %93 = vector.shape_cast %92 : vector<32xf32> to vector<1x32xf32>
    %94 = vector.extract_strided_slice %33 {offsets = [8, 0], sizes = [8, 32], strides = [1, 1]} : vector<16x32xf32> to vector<8x32xf32>
    %cst_35 = arith.constant dense<0.000000e+00> : vector<32xf32>
    %95 = vector.multi_reduction <add>, %94, %cst_35 [0] : vector<8x32xf32> to vector<32xf32>
    %96 = vector.shape_cast %95 : vector<32xf32> to vector<1x32xf32>
    %cst_36 = arith.constant 8.000000e+00 : f32
    %97 = vector.broadcast %cst_36 : f32 to vector<1x32xf32>
    %98 = arith.divf %96, %97 : vector<1x32xf32>
    %cst_37 = arith.constant dense<0xFF800000> : vector<32xf32>
    %99 = vector.multi_reduction <maximumf>, %94, %cst_37 [0] : vector<8x32xf32> to vector<32xf32>
    %100 = vector.shape_cast %99 : vector<32xf32> to vector<1x32xf32>
    %101 = tpu.concatenate %91, %93, %98, %100 in 0 : vector<1x32xf32>, vector<1x32xf32>, vector<1x32xf32>, vector<1x32xf32> -> vector<4x32xf32>
    %102 = arith.truncf %101 : vector<4x32xf32> to vector<4x32xbf16>
    %c0_38 = arith.constant 0 : index
    %c0_39 = arith.constant 0 : index
    %103 = vector.load %arg6[%c0_38, %c0_39] : memref<32x4xbf16, #tpu.memory_space<vmem>>, vector<32x4xbf16>
    %cst_40 = arith.constant dense<0.000000e+00> : vector<4x4xf32>
    %104 = tpu.matmul %102, %103, %cst_40 {dimension_numbers = #tpu.dot_dimension_numbers<[1], [0], [0], [1], [0, 0, 1, 1], [], []>} : vector<4x32xbf16>, vector<32x4xbf16>, vector<4x4xf32> -> vector<4x4xf32>
    %105 = vector.broadcast %5 : vector<1x4xf32> to vector<4x4xf32>
    %106 = arith.addf %104, %105 : vector<4x4xf32>
    %cst_41 = arith.constant 0.000000e+00 : f32
    %107 = vector.broadcast %cst_41 : f32 to vector<4x4xf32>
    %108 = arith.maximumf %106, %107 : vector<4x4xf32>
    %109 = arith.truncf %108 : vector<4x4xf32> to vector<4x4xbf16>
    %c0_42 = arith.constant 0 : index
    %c0_43 = arith.constant 0 : index
    %110 = vector.load %arg7[%c0_42, %c0_43] : memref<4x32xbf16, #tpu.memory_space<vmem>>, vector<4x32xbf16>
    %cst_44 = arith.constant dense<0.000000e+00> : vector<4x32xf32>
    %111 = tpu.matmul %109, %110, %cst_44 {dimension_numbers = #tpu.dot_dimension_numbers<[1], [0], [0], [1], [0, 0, 1, 1], [], []>} : vector<4x4xbf16>, vector<4x32xbf16>, vector<4x32xf32> -> vector<4x32xf32>
    %112 = vector.broadcast %6 : vector<1x32xf32> to vector<4x32xf32>
    %113 = arith.addf %111, %112 : vector<4x32xf32>
    %114 = arith.negf %113 : vector<4x32xf32>
    %115 = math.exp %114 : vector<4x32xf32>
    %cst_45 = arith.constant 1.000000e+00 : f32
    %116 = vector.broadcast %cst_45 : f32 to vector<4x32xf32>
    %117 = arith.addf %116, %115 : vector<4x32xf32>
    %118 = arith.divf %116, %117 : vector<4x32xf32>
    %c0_46 = arith.constant 0 : index
    %c0_47 = arith.constant 0 : index
    %119 = vector.load %arg3[%c0_46, %c0_47] : memref<16x4xbf16, #tpu.memory_space<vmem>>, vector<16x4xbf16>
    %120 = arith.truncf %118 : vector<4x32xf32> to vector<4x32xbf16>
    %cst_48 = arith.constant dense<0.000000e+00> : vector<16x32xf32>
    %121 = tpu.matmul %119, %120, %cst_48 {dimension_numbers = #tpu.dot_dimension_numbers<[1], [0], [0], [1], [0, 0, 1, 1], [], []>} : vector<16x4xbf16>, vector<4x32xbf16>, vector<16x32xf32> -> vector<16x32xf32>
    %122 = arith.mulf %33, %121 : vector<16x32xf32>
    %c3_49 = arith.constant 3 : index
    %123 = memref.load %arg11[%c3_49] : memref<4xf32, #tpu.memory_space<smem>>
    %124 = vector.broadcast %7 : vector<1x32xf32> to vector<16x32xf32>
    %125 = arith.mulf %33, %124 : vector<16x32xf32>
    %cst_50 = arith.constant dense<0.000000e+00> : vector<16xf32>
    %126 = vector.multi_reduction <add>, %125, %cst_50 [1] : vector<16x32xf32> to vector<16xf32>
    %127 = vector.shape_cast %126 : vector<16xf32> to vector<16x1xf32>
    %128 = vector.broadcast %123 : f32 to vector<16x1xf32>
    %129 = arith.addf %127, %128 : vector<16x1xf32>
    %130 = arith.negf %129 : vector<16x1xf32>
    %131 = math.exp %130 : vector<16x1xf32>
    %cst_51 = arith.constant 1.000000e+00 : f32
    %132 = vector.broadcast %cst_51 : f32 to vector<16x1xf32>
    %133 = arith.addf %132, %131 : vector<16x1xf32>
    %134 = arith.divf %132, %133 : vector<16x1xf32>
    %135 = vector.broadcast %134 : vector<16x1xf32> to vector<16x32xf32>
    %136 = arith.mulf %33, %135 : vector<16x32xf32>
    %c0_52 = arith.constant 0 : index
    %137 = memref.load %arg11[%c0_52] : memref<4xf32, #tpu.memory_space<smem>>
    %138 = vector.broadcast %137 : f32 to vector<16x32xf32>
    %139 = arith.mulf %138, %86 : vector<16x32xf32>
    %140 = arith.addf %0, %139 : vector<16x32xf32>
    %c1_53 = arith.constant 1 : index
    %141 = memref.load %arg11[%c1_53] : memref<4xf32, #tpu.memory_space<smem>>
    %142 = vector.broadcast %141 : f32 to vector<16x32xf32>
    %143 = arith.mulf %142, %122 : vector<16x32xf32>
    %144 = arith.addf %140, %143 : vector<16x32xf32>
    %c2_54 = arith.constant 2 : index
    %145 = memref.load %arg11[%c2_54] : memref<4xf32, #tpu.memory_space<smem>>
    %146 = vector.broadcast %145 : f32 to vector<16x32xf32>
    %147 = arith.mulf %146, %136 : vector<16x32xf32>
    %148 = arith.addf %144, %147 : vector<16x32xf32>
    %cst_55 = arith.constant dense<0.000000e+00> : vector<16xf32>
    %149 = vector.multi_reduction <add>, %148, %cst_55 [1] : vector<16x32xf32> to vector<16xf32>
    %150 = vector.shape_cast %149 : vector<16xf32> to vector<16x1xf32>
    %cst_56 = arith.constant 3.200000e+01 : f32
    %151 = vector.broadcast %cst_56 : f32 to vector<16x1xf32>
    %152 = arith.divf %150, %151 : vector<16x1xf32>
    %153 = vector.broadcast %152 : vector<16x1xf32> to vector<16x32xf32>
    %154 = arith.subf %148, %153 : vector<16x32xf32>
    %155 = arith.mulf %154, %154 : vector<16x32xf32>
    %cst_57 = arith.constant dense<0.000000e+00> : vector<16xf32>
    %156 = vector.multi_reduction <add>, %155, %cst_57 [1] : vector<16x32xf32> to vector<16xf32>
    %157 = vector.shape_cast %156 : vector<16xf32> to vector<16x1xf32>
    %cst_58 = arith.constant 3.200000e+01 : f32
    %158 = vector.broadcast %cst_58 : f32 to vector<16x1xf32>
    %159 = arith.divf %157, %158 : vector<16x1xf32>
    %160 = vector.broadcast %152 : vector<16x1xf32> to vector<16x32xf32>
    %161 = arith.subf %148, %160 : vector<16x32xf32>
    %cst_59 = arith.constant 9.99999974E-6 : f32
    %162 = vector.broadcast %cst_59 : f32 to vector<16x1xf32>
    %163 = arith.addf %159, %162 : vector<16x1xf32>
    %164 = math.rsqrt %163 : vector<16x1xf32>
    %165 = vector.broadcast %164 : vector<16x1xf32> to vector<16x32xf32>
    %166 = arith.mulf %161, %165 : vector<16x32xf32>
    %167 = vector.broadcast %8 : vector<1x32xf32> to vector<16x32xf32>
    %168 = arith.mulf %166, %167 : vector<16x32xf32>
    %169 = vector.broadcast %9 : vector<1x32xf32> to vector<16x32xf32>
    %170 = arith.addf %168, %169 : vector<16x32xf32>
    %171 = arith.truncf %170 : vector<16x32xf32> to vector<16x32xbf16>
    %c0_60 = arith.constant 0 : index
    %c0_61 = arith.constant 0 : index
    %172 = vector.load %arg8[%c0_60, %c0_61] : memref<32x128xbf16, #tpu.memory_space<vmem>>, vector<32x128xbf16>
    %cst_62 = arith.constant dense<0.000000e+00> : vector<16x128xf32>
    %173 = tpu.matmul %171, %172, %cst_62 {dimension_numbers = #tpu.dot_dimension_numbers<[1], [0], [0], [1], [0, 0, 1, 1], [], []>} : vector<16x32xbf16>, vector<32x128xbf16>, vector<16x128xf32> -> vector<16x128xf32>
    %174 = vector.broadcast %10 : vector<1x128xf32> to vector<16x128xf32>
    %175 = arith.addf %173, %174 : vector<16x128xf32>
    %cst_63 = arith.constant 5.000000e-01 : f32
    %176 = vector.broadcast %cst_63 : f32 to vector<16x128xf32>
    %177 = arith.mulf %176, %175 : vector<16x128xf32>
    %cst_64 = arith.constant 0.707106769 : f32
    %178 = vector.broadcast %cst_64 : f32 to vector<16x128xf32>
    %179 = arith.mulf %175, %178 : vector<16x128xf32>
    %180 = math.erf %179 : vector<16x128xf32>
    %cst_65 = arith.constant 1.000000e+00 : f32
    %181 = vector.broadcast %cst_65 : f32 to vector<16x128xf32>
    %182 = arith.addf %181, %180 : vector<16x128xf32>
    %183 = arith.mulf %177, %182 : vector<16x128xf32>
    %184 = arith.truncf %183 : vector<16x128xf32> to vector<16x128xbf16>
    %c0_66 = arith.constant 0 : index
    %c0_67 = arith.constant 0 : index
    %185 = vector.load %arg9[%c0_66, %c0_67] : memref<128x32xbf16, #tpu.memory_space<vmem>>, vector<128x32xbf16>
    %cst_68 = arith.constant dense<0.000000e+00> : vector<16x32xf32>
    %186 = tpu.matmul %184, %185, %cst_68 {dimension_numbers = #tpu.dot_dimension_numbers<[1], [0], [0], [1], [0, 0, 1, 1], [], []>} : vector<16x128xbf16>, vector<128x32xbf16>, vector<16x32xf32> -> vector<16x32xf32>
    %187 = vector.broadcast %11 : vector<1x32xf32> to vector<16x32xf32>
    %188 = arith.addf %186, %187 : vector<16x32xf32>
    %189 = arith.addf %148, %188 : vector<16x32xf32>
    %c0_69 = arith.constant 0 : index
    %c0_70 = arith.constant 0 : index
    %190 = vector.load %arg12[%c0_69, %c0_70] : memref<16x32xf32, #tpu.memory_space<vmem>>, vector<16x32xf32>
    tpu.vector_store %arg12[%c0_69, %c0_70], %189 {strides = array<i32>} : memref<16x32xf32, #tpu.memory_space<vmem>>, vector<16x32xf32>,
    return
  }
}

</mosaic_0001>

<bundles_post_ra>
// kernel: tpu_custom_call.1
= control target key start
LH: loop header
LB: loop body
LE: loop exit
PB: predicated region body
PF: predicated region fallthrough
CT: control target
= control target key end

     0   :  { %17 = vsyncpa [#allocation4], 0  ;;  %s2303_s0 = inlined_call_operand.vmem [shape: f32[16,32], index: 0, kind: input, shape index: {}]   ;;  %s2304_s1 = inlined_call_operand.vmem [shape: bf16[128,32], index: 1, kind: input, shape index: {}]   ;;  %s2305_s2 = inlined_call_operand.vmem [shape: f32[128,16], index: 2, kind: input, shape index: {}]   ;;  %s2306_s3 = inlined_call_operand.vmem [shape: bf16[16,4], index: 3, kind: input, shape index: {}]   ;;  %s2307_s4 = inlined_call_operand.vmem [shape: bf16[32,96], index: 4, kind: input, shape index: {}]   ;;  %s2308_s5 = inlined_call_operand.vmem [shape: bf16[32,32], index: 5, kind: input, shape index: {}]   ;;  %s2309_s6 = inlined_call_operand.vmem [shape: bf16[32,4], index: 6, kind: input, shape index: {}]   ;;  %s2310_s7 = inlined_call_operand.vmem [shape: bf16[4,32], index: 7, kind: input, shape index: {}]   ;;  %s2311_s8 = inlined_call_operand.vmem [shape: bf16[32,128], index: 8, kind: input, shape index: {}]   ;;  %s2312_s9 = inlined_call_operand.vmem [shape: bf16[128,32], index: 9, kind: input, shape index: {}]   ;;  %s2313_s10 = inlined_call_operand.vmem [shape: f32[11,128], index: 10, kind: input, shape index: {}]   ;;  %s2314_s11 = inlined_call_operand.vmem [shape: f32[4], index: 11, kind: input, shape index: {}]   ;;  %s2315_s12 = inlined_call_operand.hbm [shape: f32[16,32], index: 12, kind: output, shape index: {}]  }
   0x1   :  { %18 = vsyncpa [#allocation3], 0  ;;  %s47_s23 = sshll.u32 %s2314_s11, 4  ;;  %s48_s23 = int_to_ptr.vmem [resolvable:$true] %s47_s23 }
   0x2   :  { %s1693_s24 = scalar_lea.vmem %s48_s23, 16  ;;  %p1698_p1 = scmp.lt.s32.totalorder %s48_s23, %s48_s23 }
   0x3   :  { %p1694_p0 = scmp.ne.s32.totalorder %s48_s23, %s1693_s24  ;;  %p1699_p2 = scmp.lt.s32.totalorder %s1693_s24, %s1693_s24 }
   0x5   :  { %p1700_p3 = por %p1699_p2, %p1698_p1 }
   0x7   :  { %p1701_p4 = pnand %p1700_p3, %p1694_p0 }
   0x9   :  { %1704 = shalt.err (!%p1701_p4)
}
   0xa   :  { %s1731_s25 = smov [#allocation2]  }
   0xb   :  { %50 = dma.vmem_to_smem %s48_s23, 16, %s1731_s25, [#allocation4]  }
   0xc   :  { %1727 = dma.done.wait [#allocation4], 16  }
   0xd   :  { %1728 = vsyncadd [#allocation4], 4294967280 }
   0xe   :  { %54 = sfence }
   0xf   :  { %v56_v0 = vld [vmem:[%s2303_s0] sm:$0xff]  ;;  %vm69_vm0 = vcmask 261120   ;;  %v57_v1 = vld [vmem:[%s2303_s0 + $0x8] sm:$0xff]  ;;  %v1732_v15 = vmov 0.0   ;;  %vm1733_vm1 = vmmov 0   ;;  %s1734_s22 = smov 96  }
  0x10   :  { %v70_v2 = vsel %vm69_vm0, %v56_v0, 0.0  ;;  %v73_v3 = vsel %vm69_vm0, %v57_v1, 0.0  ;;  %v1570_v14 = vld [vmem:[%s2307_s4] sm:$0xff]   ;;  %1459 = vmatprep.subr.bf16.mxu0 %v1732_v15  ;;  %v1571_v16 = vld [vmem:[%s2307_s4 + $0x8] sm:$0xff]   ;;  %1463 = vmatprep.mubr.msk.bf16.mxu0 %vm1733_vm1, %v1732_v15  ;;  %v1864_v47 = vld [vmem:[%s2304_s1 + $0x10] sm:$0xff]   ;;  %vm422_vm2 = vcmask 130048  }
  0x11   :  { %71 = vadd.xlane.f32.xlu0 %v70_v2  ;;  %1460 = vmatpush3.bf16.msra.mxu0 %v1570_v14  ;;  %v1352_v25 = vld [vmem:[%s2313_s10] ss:$0 sm:$0xff]  ;;  %v1353_v29 = vld [vmem:[%s2313_s10 + $0x1] ss:$0 sm:$0xff]  ;;  %v1354_v34 = vld [vmem:[%s2313_s10 + $0x2] ss:$0 sm:$0xff] }
  0x12   :  { %1461 = vmatprep.subr.bf16.mxu0 %v1732_v15  ;;  %v1846_v36 = vld [vmem:[%s2304_s1] sm:$0xff]   ;;  %v1857_v45 = vld [vmem:[%s2304_s1 + $0x8] sm:$0xff]   ;;  %v1873_v50 = vld [vmem:[%s2304_s1 + $0x18] sm:$0xff]   ;;  %s1735_s28 = smov 64   ;;  %vm873_vm3 = vcmask 1040384   ;;  %vm875_vm4 = vcmask 1041408  }
  0x13   :  { %v1879_v51 = vld [vmem:[%s2304_s1 + $0x20] sm:$0xff]   ;;  %v1889_v54 = vld [vmem:[%s2304_s1 + $0x28] sm:$0xff]   ;;  %v1895_v55 = vld [vmem:[%s2304_s1 + $0x30] sm:$0xff]   ;;  %vm877_vm5 = vcmask 1042432   ;;  %vm950_vm6 = vcmask 31744   ;;  %s1395_s21 = sld [smem:[#allocation2 + $0x3]] }
  0x14   :  { %v1905_v58 = vld [vmem:[%s2304_s1 + $0x38] sm:$0xff]   ;;  %v392_v61 = vld [vmem:[%s2305_s2 + $0x10] sm:$0xff]  ;;  %v390_v2 = vld [vmem:[%s2305_s2] sm:$0xff]  ;;  %s1399_s24 = sld [smem:[#allocation2 + $0x1]]  ;;  %s1400_s25 = sld [smem:[#allocation2 + $0x2]] }
  0x15   :  { %74 = vadd.xlane.f32.xlu0 %v73_v3  ;;  %1462 = vmatpush3.bf16.msra.mxu0 %v1571_v16  ;;  %v391_v16 = vld [vmem:[%s2305_s2 + $0x8] sm:$0xff] }
  0x9e   :  { %v72_v4 = vpop.xlane.xlu0 %71 }
  0x9f   :  { %v77_v5 = vmul.f32 0.03125, %v72_v4 }
  0xa1   :  { %v79_v6 = vsub.f32 %v56_v0, %v77_v5 }
  0xa2   :  { %v75_v7 = vpop.xlane.xlu0 %74 }
  0xa3   :  { %v78_v8 = vmul.f32 0.03125, %v75_v7  ;;  %v81_v9 = vmul.f32 %v79_v6, %v79_v6 }
  0xa5   :  { %v80_v10 = vsub.f32 %v57_v1, %v78_v8  ;;  %v83_v11 = vsel %vm69_vm0, %v81_v9, 0.0  ;;  %v393_v8 = vld [vmem:[%s2305_s2 + $0x18] sm:$0xff] }
  0xa6   :  { %84 = vadd.xlane.f32.xlu1 %v83_v11 }
  0xa7   :  { %v82_v12 = vmul.f32 %v80_v10, %v80_v10 }
  0xa9   :  { %v86_v13 = vsel %vm69_vm0, %v82_v12, 0.0 }
  0xaa   :  { %87 = vadd.xlane.f32.xlu1 %v86_v13 }
 0x133   :  { %v85_v17 = vpop.xlane.xlu1 %84 }
 0x134   :  { %v89_v18 = vmul.f32 0.03125, %v85_v17 }
 0x136   :  { %v91_v19 = vadd.f32 1e-05, %v89_v18 }
 0x137   :  { %v88_v20 = vpop.xlane.xlu1 %87 }
 0x138   :  { %1603 = vrsqrt.f32 %v91_v19  ;;  %v90_v21 = vmul.f32 0.03125, %v88_v20 }
 0x13a   :  { %v92_v22 = vadd.f32 1e-05, %v90_v21  ;;  %v394_v21 = vld [vmem:[%s2305_s2 + $0x20] sm:$0xff] }
 0x13c   :  { %1605 = vrsqrt.f32 %v92_v22 }
 0x142   :  { %v1604_v23 = vpop.eup %1603 }
 0x143   :  { %v95_v24 = vmul.f32 %v1604_v23, %v79_v6  ;;  %v400_v23 = vld [vmem:[%s2305_s2 + $0x50] sm:$0xff] }
 0x145   :  { %v101_v27 = vmul.f32 %v1352_v25, %v95_v24 }
 0x146   :  { %v1606_v26 = vpop.eup %1605 }
 0x147   :  { %v96_v28 = vmul.f32 %v1606_v26, %v80_v10  ;;  %v1833_v31 = vadd.f32 %v1353_v29, %v101_v27 }
 0x149   :  { %v102_v30 = vmul.f32 %v1352_v25, %v96_v28 }
 0x14b   :  { %v1835_v32 = vadd.f32 %v1353_v29, %v102_v30  ;;  %v395_v30 = vld [vmem:[%s2305_s2 + $0x28] sm:$0xff] }
 0x14d   :  { %v109_v33 = vpack.c.bf16 %v1835_v32, %v1833_v31 }
 0x14f   :  { %1464 = vmatmul.mubr.msk.bf16.vlgmr.msra.gmra.mrb[0].mxu0 %vm69_vm0, %v109_v33 }
 0x222   :  { %v167_v35 = vpop.f32.mrb[0].mxu0 }
 0x223   :  { %v1465_v37 = vpop.f32.mrb[1].mxu0  ;;  %v168_v39 = vadd.f32 %v1354_v34, %v167_v35 }
 0x224   :  { %v170_v38 = vpop.f32.mrb[2].mxu0 }
 0x225   :  { %v171_v40 = vadd.f32 %v1354_v34, %v170_v38  ;;  %v1466_v41 = vpop.f32.mrb[3].mxu0 }
 0x227   :  { %v1848_v42 = vpack.c.bf16 %v171_v40, %v168_v39  ;;  %v396_v40 = vld [vmem:[%s2305_s2 + $0x30] sm:$0xff] }
 0x229   :  { %248 = vrot.lane.b32.xlu0 %v1848_v42, %s1734_s22  ;;  %v239_v43 = vmul.bf16 %v1848_v42, %v1846_v36  ;;  %v240_v48 = vmul.bf16 %v1848_v42, %v1857_v45  ;;  %v241_v49 = vmul.bf16 %v1848_v42, %v1864_v47  ;;  %v242_v52 = vmul.bf16 %v1848_v42, %v1873_v50 }
 0x22a   :  { %v243_v53 = vmul.bf16 %v1848_v42, %v1879_v51  ;;  %v244_v56 = vmul.bf16 %v1848_v42, %v1889_v54  ;;  %v245_v57 = vmul.bf16 %v1848_v42, %v1895_v55  ;;  %v246_v59 = vmul.bf16 %v1848_v42, %v1905_v58 }
 0x22b   :  { %1469 = vmatprep.mubr.msk.bf16.mxu1 %vm69_vm0, %v239_v43 }
 0x29b   :  { %v249_v44 = vpop.permute.xlu0 %248 }
 0x29c   :  { %1561 = vmatprep.subr.msk.bf16.mxu1 %vm69_vm0, %v249_v44  ;;  %v275_v46 = vsel %vm69_vm0, %v249_v44, 0 }
 0x29d   :  { %1468 = vmatpush3.bf16.xpose.msra.mxu1 %v275_v46 }
 0x2a4   :  { %1470 = vmatmul.mubr.msk.bf16.vlgmr.msra.gmra.mrb[0].mxu1 %vm69_vm0, %v240_v48 }
 0x2a5   :  { %1473 = vmatprep.mubr.msk.bf16.mxu1 %vm69_vm0, %v241_v49 }
 0x2ac   :  { %1474 = vmatmul.mubr.msk.bf16.gmra.mrb[4].mxu1 %vm69_vm0, %v242_v52  ;;  %v405_v52 = vld [vmem:[%s2305_s2 + $0x78] sm:$0xff] }
 0x2ad   :  { %1477 = vmatprep.mubr.msk.bf16.mxu1 %vm69_vm0, %v243_v53  ;;  %v397_v53 = vld [vmem:[%s2305_s2 + $0x38] sm:$0xff] }
 0x2b4   :  { %1478 = vmatmul.mubr.msk.bf16.gmra.mrb[8].mxu1 %vm69_vm0, %v244_v56 }
 0x2b5   :  { %1481 = vmatprep.mubr.msk.bf16.mxu1 %vm69_vm0, %v245_v57 }
 0x2bc   :  { %1482 = vmatmul.mubr.msk.bf16.gmra.mrb[12].mxu1 %vm69_vm0, %v246_v59 }
 0x377   :  { %v1471_v60 = vpop.f32.mrb[0].mxu1 }
 0x378   :  { %v376_v62 = vmul.f32 0.5, %v1471_v60  ;;  %v311_v63 = vpop.f32.mrb[1].mxu1 }
 0x379   :  { %v374_v0 = vmul.f32 0.5, %v311_v63  ;;  %v1472_v1 = vpop.f32.mrb[2].mxu1  ;;  %v398_v63 = vld [vmem:[%s2305_s2 + $0x40] sm:$0xff] }
 0x37a   :  { %v314_v3 = vpop.f32.mrb[3].mxu1  ;;  %v1918_v4 = vadd.f32 %v392_v61, %v376_v62  ;;  %v377_v5 = vmul.f32 0.5, %v1472_v1 }
 0x37b   :  { %v1922_v7 = vadd.f32 %v390_v2, %v374_v0  ;;  %v375_v10 = vmul.f32 0.5, %v314_v3 }
 0x37c   :  { %v429_v6 = vsel %vm422_vm2, %v1918_v4, -inf  ;;  %v1929_v13 = vadd.f32 %v393_v8, %v377_v5  ;;  %v401_v5 = vld [vmem:[%s2305_s2 + $0x58] sm:$0xff] }
 0x37d   :  { %430 = vmax.xlane.f32.xlu1 %v429_v6  ;;  %v423_v12 = vsel %vm422_vm2, %v1922_v7, -inf  ;;  %v1936_v20 = vadd.f32 %v391_v16, %v375_v10  ;;  %v399_v10 = vld [vmem:[%s2305_s2 + $0x48] sm:$0xff]  ;;  %v402_v16 = vld [vmem:[%s2305_s2 + $0x60] sm:$0xff] }
 0x37e   :  { %v432_v19 = vsel %vm422_vm2, %v1929_v13, -inf }
 0x37f   :  { %v1475_v9 = vpop.f32.mrb[4].mxu1  ;;  %v426_v27 = vsel %vm422_vm2, %v1936_v20, -inf }
 0x380   :  { %v327_v11 = vpop.f32.mrb[5].mxu1  ;;  %v380_v35 = vmul.f32 0.5, %v1475_v9 }
 0x381   :  { %424 = vmax.xlane.f32.xlu1 %v423_v12  ;;  %v1476_v14 = vpop.f32.mrb[6].mxu1  ;;  %v378_v18 = vmul.f32 0.5, %v327_v11 }
 0x382   :  { %v330_v17 = vpop.f32.mrb[7].mxu1  ;;  %v381_v43 = vmul.f32 0.5, %v1476_v14  ;;  %v1964_v48 = vadd.f32 %v396_v40, %v380_v35 }
 0x383   :  { %v379_v24 = vmul.f32 0.5, %v330_v17  ;;  %v1946_v28 = vadd.f32 %v394_v21, %v378_v18  ;;  %v403_v21 = vld [vmem:[%s2305_s2 + $0x68] sm:$0xff] }
 0x384   :  { %v441_v60 = vsel %vm422_vm2, %v1964_v48, -inf  ;;  %v1976_v62 = vadd.f32 %v397_v53, %v381_v43 }
 0x385   :  { %433 = vmax.xlane.f32.xlu1 %v432_v19  ;;  %v435_v37 = vsel %vm422_vm2, %v1946_v28, -inf  ;;  %v1957_v39 = vadd.f32 %v395_v30, %v379_v24 }
 0x386   :  { %v444_v2 = vsel %vm422_vm2, %v1976_v62, -inf }
 0x387   :  { %v1479_v22 = vpop.f32.mrb[8].mxu1  ;;  %v438_v46 = vsel %vm422_vm2, %v1957_v39, -inf }
 0x388   :  { %v384_v25 = vmul.f32 0.5, %v1479_v22  ;;  %v343_v26 = vpop.f32.mrb[9].mxu1 }
 0x389   :  { %427 = vmax.xlane.f32.xlu1 %v426_v27  ;;  %v1480_v29 = vpop.f32.mrb[10].mxu1  ;;  %v382_v59 = vmul.f32 0.5, %v343_v26 }
 0x38a   :  { %v346_v33 = vpop.f32.mrb[11].mxu1  ;;  %v1951_v34 = vadd.f32 %v400_v23, %v384_v25  ;;  %v385_v1 = vmul.f32 0.5, %v1480_v29  ;;  %v404_v25 = vld [vmem:[%s2305_s2 + $0x70] sm:$0xff] }
 0x38b   :  { %v1985_v3 = vadd.f32 %v398_v63, %v382_v59  ;;  %v383_v6 = vmul.f32 0.5, %v346_v33 }
 0x38c   :  { %v453_v38 = vsel %vm422_vm2, %v1951_v34, -inf  ;;  %v1992_v9 = vadd.f32 %v401_v5, %v385_v1 }
 0x38d   :  { %436 = vmax.xlane.f32.xlu1 %v435_v37  ;;  %454 = vmax.xlane.f32.xlu0 %v453_v38  ;;  %v447_v8 = vsel %vm422_vm2, %v1985_v3, -inf  ;;  %v1999_v14 = vadd.f32 %v399_v10, %v383_v6 }
 0x38e   :  { %v456_v12 = vsel %vm422_vm2, %v1992_v9, -inf }
 0x38f   :  { %v1483_v41 = vpop.f32.mrb[12].mxu1  ;;  %v450_v18 = vsel %vm422_vm2, %v1999_v14, -inf }
 0x390   :  { %v359_v44 = vpop.f32.mrb[13].mxu1  ;;  %v388_v22 = vmul.f32 0.5, %v1483_v41 }
 0x391   :  { %439 = vmax.xlane.f32.xlu1 %v438_v46  ;;  %v1484_v49 = vpop.f32.mrb[14].mxu1  ;;  %v386_v11 = vmul.f32 0.5, %v359_v44 }
 0x392   :  { %v389_v56 = vmul.f32 0.5, %v1484_v49  ;;  %v362_v57 = vpop.f32.mrb[15].mxu1  ;;  %v2020_v27 = vadd.f32 %v404_v25, %v388_v22 }
 0x393   :  { %v387_v17 = vmul.f32 0.5, %v362_v57  ;;  %v2006_v19 = vadd.f32 %v402_v16, %v386_v11 }
 0x394   :  { %v1974_v61 = vadd.f32 %v405_v52, %v389_v56  ;;  %v465_v29 = vsel %vm422_vm2, %v2020_v27, -inf }
 0x395   :  { %442 = vmax.xlane.f32.xlu1 %v441_v60  ;;  %v459_v23 = vsel %vm422_vm2, %v2006_v19, -inf  ;;  %v2013_v24 = vadd.f32 %v403_v21, %v387_v17 }
 0x396   :  { %v468_v0 = vsel %vm422_vm2, %v1974_v61, -inf }
 0x397   :  { %469 = vmax.xlane.f32.xlu0 %v468_v0  ;;  %v462_v26 = vsel %vm422_vm2, %v2013_v24, -inf }
 0x399   :  { %445 = vmax.xlane.f32.xlu1 %v444_v2 }
 0x39d   :  { %448 = vmax.xlane.f32.xlu1 %v447_v8 }
 0x3a1   :  { %457 = vmax.xlane.f32.xlu1 %v456_v12 }
 0x3a5   :  { %451 = vmax.xlane.f32.xlu1 %v450_v18 }
 0x3a9   :  { %460 = vmax.xlane.f32.xlu1 %v459_v23 }
 0x3ad   :  { %463 = vmax.xlane.f32.xlu1 %v462_v26 }
 0x3b1   :  { %466 = vmax.xlane.f32.xlu1 %v465_v29 }
 0x40a   :  { %v431_v30 = vpop.xlane.xlu1 %430 }
 0x40b   :  { %v473_v33 = vsub.f32 %v1918_v4, %v431_v30 }
 0x40d   :  { %v491_v35 = vmul.f32 1.442695, %v473_v33 }
 0x40e   :  { %v425_v37 = vpop.xlane.xlu1 %424 }
 0x40f   :  { %1607 = vpow2.f32 %v491_v35  ;;  %v471_v38 = vsub.f32 %v1922_v7, %v425_v37 }
 0x411   :  { %v487_v40 = vmul.f32 1.442695, %v471_v38 }
 0x412   :  { %v434_v41 = vpop.xlane.xlu1 %433 }
 0x413   :  { %1609 = vpow2.f32 %v487_v40  ;;  %v474_v43 = vsub.f32 %v1929_v13, %v434_v41 }
 0x415   :  { %v493_v44 = vmul.f32 1.442695, %v474_v43 }
 0x416   :  { %v428_v46 = vpop.xlane.xlu1 %427 }
 0x417   :  { %1611 = vpow2.f32 %v493_v44  ;;  %v472_v49 = vsub.f32 %v1936_v20, %v428_v46 }
 0x419   :  { %v2028_v52 = vpop.eup %1607  ;;  %v489_v53 = vmul.f32 1.442695, %v472_v49 }
 0x41a   :  { %v437_v56 = vpop.xlane.xlu1 %436  ;;  %v525_v4 = vsel %vm422_vm2, %v2028_v52, 0.0  ;;  %v455_v0 = vpop.xlane.xlu0 %454 }
 0x41b   :  { %1613 = vpow2.f32 %v489_v53  ;;  %526 = vadd.xlane.f32.xlu1 %v525_v4  ;;  %v475_v20 = vsub.f32 %v1946_v28, %v437_v56 }
 0x41d   :  { %v2032_v7 = vpop.eup %1609  ;;  %v495_v8 = vmul.f32 1.442695, %v475_v20 }
 0x41e   :  { %v440_v57 = vpop.xlane.xlu1 %439  ;;  %v519_v13 = vsel %vm422_vm2, %v2032_v7, 0.0 }
 0x41f   :  { %v476_v59 = vsub.f32 %v1957_v39, %v440_v57  ;;  %520 = vadd.xlane.f32.xlu1 %v519_v13  ;;  %v481_v39 = vsub.f32 %v1951_v34, %v455_v0 }
 0x421   :  { %v2037_v60 = vpop.eup %1611  ;;  %v497_v63 = vmul.f32 1.442695, %v476_v59  ;;  %v507_v12 = vmul.f32 1.442695, %v481_v39 }
 0x422   :  { %v443_v1 = vpop.xlane.xlu1 %442  ;;  %v528_v2 = vsel %vm422_vm2, %v2037_v60, 0.0 }
 0x423   :  { %1615 = vpow2.f32 %v497_v63  ;;  %v477_v5 = vsub.f32 %v1964_v48, %v443_v1  ;;  %529 = vadd.xlane.f32.xlu0 %v528_v2 }
 0x425   :  { %v2043_v6 = vpop.eup %1613  ;;  %v499_v10 = vmul.f32 1.442695, %v477_v5 }
 0x426   :  { %v446_v11 = vpop.xlane.xlu1 %445  ;;  %v522_v28 = vsel %vm422_vm2, %v2043_v6, 0.0 }
 0x427   :  { %1617 = vpow2.f32 %v499_v10  ;;  %523 = vadd.xlane.f32.xlu0 %v522_v28  ;;  %v478_v25 = vsub.f32 %v1976_v62, %v446_v11 }
 0x428   :  { %1619 = vpow2.f32 %v495_v8  ;;  %v1396_v8 = vld [vmem:[%s2313_s10 + $0x6] ss:$0 sm:$0xff] }
 0x429   :  { %1621 = vpow2.f32 %v507_v12  ;;  %v501_v35 = vmul.f32 1.442695, %v478_v25  ;;  %v1065_v28 = vmul.f32 %v1396_v8, %v1833_v31 }
 0x42a   :  { %v449_v16 = vpop.xlane.xlu1 %448 }
 0x42b   :  { %v479_v17 = vsub.f32 %v1985_v3, %v449_v16  ;;  %v1067_v16 = vsel %vm69_vm0, %v1065_v28, 0.0 }
 0x42d   :  { %v2049_v18 = vpop.eup %1615  ;;  %v503_v48 = vmul.f32 1.442695, %v479_v17 }
 0x42e   :  { %v458_v21 = vpop.xlane.xlu1 %457  ;;  %v534_v34 = vsel %vm422_vm2, %v2049_v18, 0.0 }
 0x42f   :  { %v482_v22 = vsub.f32 %v1992_v9, %v458_v21  ;;  %535 = vadd.xlane.f32.xlu0 %v534_v34  ;;  %1623 = vpow2.f32 %v503_v48  ;;  %v470_v9 = vpop.xlane.xlu0 %469  ;;  %v1066_v48 = vmul.f32 %v1396_v8, %v1835_v32 }
 0x430   :  { %v486_v41 = vsub.f32 %v1974_v61, %v470_v9 }
 0x431   :  { %v2054_v23 = vpop.eup %1617  ;;  %v509_v26 = vmul.f32 1.442695, %v482_v22  ;;  %v1070_v21 = vsel %vm69_vm0, %v1066_v48, 0.0 }
 0x432   :  { %v452_v29 = vpop.xlane.xlu1 %451  ;;  %v537_v3 = vsel %vm422_vm2, %v2054_v23, 0.0  ;;  %v2059_v30 = vpop.eup %1619  ;;  %v517_v53 = vmul.f32 1.442695, %v486_v41 }
 0x433   :  { %1625 = vpow2.f32 %v509_v26  ;;  %v480_v33 = vsub.f32 %v1999_v14, %v452_v29  ;;  %538 = vadd.xlane.f32.xlu1 %v537_v3  ;;  %v531_v40 = vsel %vm422_vm2, %v2059_v30, 0.0  ;;  %v2064_v62 = vpop.eup %1621 }
 0x434   :  { %v549_v44 = vsel %vm422_vm2, %v2064_v62, 0.0 }
 0x435   :  { %v505_v37 = vmul.f32 1.442695, %v480_v33 }
 0x436   :  { %v461_v38 = vpop.xlane.xlu1 %460 }
 0x437   :  { %1627 = vpow2.f32 %v505_v37  ;;  %532 = vadd.xlane.f32.xlu1 %v531_v40  ;;  %v483_v56 = vsub.f32 %v2006_v19, %v461_v38 }
 0x438   :  { %1629 = vpow2.f32 %v501_v35 }
 0x439   :  { %v2069_v14 = vpop.eup %1623  ;;  %v511_v20 = vmul.f32 1.442695, %v483_v56 }
 0x43a   :  { %v464_v43 = vpop.xlane.xlu1 %463  ;;  %v543_v13 = vsel %vm422_vm2, %v2069_v14, 0.0 }
 0x43b   :  { %v484_v46 = vsub.f32 %v2013_v24, %v464_v43  ;;  %550 = vadd.xlane.f32.xlu1 %v549_v44 }
 0x43d   :  { %v2072_v49 = vpop.eup %1625  ;;  %v513_v4 = vmul.f32 1.442695, %v484_v46  ;;  %v842_v46 = vsel %vm69_vm0, %v1833_v31, 0.0 }
 0x43e   :  { %v467_v57 = vpop.xlane.xlu1 %466  ;;  %v552_v61 = vsel %vm422_vm2, %v2072_v49, 0.0 }
 0x43f   :  { %1631 = vpow2.f32 %v513_v4  ;;  %v485_v59 = vsub.f32 %v2020_v27, %v467_v57  ;;  %553 = vadd.xlane.f32.xlu0 %v552_v61  ;;  %544 = vadd.xlane.f32.xlu1 %v543_v13  ;;  %v851_v4 = vsel %vm69_vm0, %v1833_v31, -inf }
 0x440   :  { %1633 = vpow2.f32 %v517_v53  ;;  %v858_v53 = vsel %vm69_vm0, %v1835_v32, 0.0 }
 0x441   :  { %v2080_v24 = vpop.eup %1627  ;;  %v515_v63 = vmul.f32 1.442695, %v485_v59  ;;  %v859_v56 = vrot.slane %v858_v53, 4 }
 0x442   :  { %v546_v19 = vsel %vm422_vm2, %v2080_v24, 0.0  ;;  %v2084_v0 = vpop.eup %1629 }
 0x443   :  { %1635 = vpow2.f32 %v515_v63  ;;  %547 = vadd.xlane.f32.xlu0 %v546_v19  ;;  %v540_v1 = vsel %vm422_vm2, %v2084_v0, 0.0  ;;  %v860_v59 = vadd.f32 %v859_v56, %v858_v53  ;;  %v866_v19 = vsel %vm69_vm0, %v1835_v32, -inf }
 0x444   :  { %1637 = vpow2.f32 %v511_v20  ;;  %v852_v20 = vrot.slane %v851_v4, 4 }
 0x445   :  { %v861_v28 = vrot.slane %v860_v59, 2 }
 0x446   :  { %v853_v48 = vmax.f32 %v851_v4, %v852_v20 }
 0x447   :  { %541 = vadd.xlane.f32.xlu0 %v540_v1 }
 0x449   :  { %v2088_v27 = vpop.eup %1631 }
 0x44a   :  { %v558_v2 = vsel %vm422_vm2, %v2088_v27, 0.0  ;;  %v2092_v5 = vpop.eup %1633 }
 0x44b   :  { %559 = vadd.xlane.f32.xlu0 %v558_v2  ;;  %v564_v10 = vsel %vm422_vm2, %v2092_v5, 0.0 }
 0x44d   :  { %v2097_v39 = vpop.eup %1635 }
 0x44e   :  { %v561_v11 = vsel %vm422_vm2, %v2097_v39, 0.0  ;;  %v2104_v12 = vpop.eup %1637 }
 0x44f   :  { %565 = vadd.xlane.f32.xlu0 %v564_v10  ;;  %562 = vadd.xlane.f32.xlu1 %v561_v11  ;;  %v555_v17 = vsel %vm422_vm2, %v2104_v12, 0.0 }
 0x453   :  { %1068 = vadd.xlane.f32.xlu0 %v1067_v16  ;;  %556 = vadd.xlane.f32.xlu1 %v555_v17 }
 0x457   :  { %1071 = vadd.xlane.f32.xlu0 %v1070_v21  ;;  %v867_v21 = vrot.slane %v866_v19, 4 }
 0x464   :  { %607 = vrot.lane.b32.xlu1 %v1848_v42, %s1735_s28  ;;  %s1736_s28 = smov [#allocation5]  }
 0x4a8   :  { %v527_v34 = vpop.xlane.xlu1 %526 }
 0x4ac   :  { %v521_v22 = vpop.xlane.xlu1 %520 }
 0x4ad   :  { %1639 = vrcp.f32 %v521_v22 }
 0x4b0   :  { %v530_v25 = vpop.xlane.xlu0 %529 }
 0x4b4   :  { %v524_v26 = vpop.xlane.xlu0 %523 }
 0x4b5   :  { %1641 = vrcp.f32 %v524_v26 }
 0x4b7   :  { %v1640_v29 = vpop.eup %1639 }
 0x4b8   :  { %v583_v35 = vmul.f32 %v1640_v29, %v2032_v7 }
 0x4bc   :  { %v536_v40 = vpop.xlane.xlu0 %535 }
 0x4bf   :  { %v1642_v3 = vpop.eup %1641 }
 0x4c0   :  { %v539_v33 = vpop.xlane.xlu1 %538  ;;  %v584_v37 = vmul.f32 %v1642_v3, %v2043_v6  ;;  %v843_v6 = vrot.slane %v842_v46, 4  ;;  %v854_v3 = vrot.slane %v853_v48, 2 }
 0x4c2   :  { %v599_v9 = vpack.c.bf16 %v584_v37, %v583_v35  ;;  %v844_v61 = vadd.f32 %v843_v6, %v842_v46  ;;  %v868_v35 = vmax.f32 %v866_v19, %v867_v21 }
 0x4c4   :  { %1487 = vmatprep.mubr.msk.bf16.mxu0 %vm422_vm2, %v599_v9  ;;  %v533_v38 = vpop.xlane.xlu1 %532  ;;  %v845_v11 = vrot.slane %v844_v61, 2 }
 0x4c6   :  { %v846_v26 = vadd.f32 %v845_v11, %v844_v61 }
 0x4c8   :  { %v551_v41 = vpop.xlane.xlu1 %550 }
 0x4cc   :  { %v554_v42 = vpop.xlane.xlu0 %553  ;;  %v545_v43 = vpop.xlane.xlu1 %544 }
 0x4cd   :  { %1643 = vrcp.f32 %v545_v43 }
 0x4d0   :  { %v548_v44 = vpop.xlane.xlu0 %547 }
 0x4d1   :  { %1645 = vrcp.f32 %v548_v44 }
 0x4d2   :  { %1647 = vrcp.f32 %v527_v34 }
 0x4d3   :  { %1649 = vrcp.f32 %v530_v25 }
 0x4d4   :  { %v542_v7 = vpop.xlane.xlu0 %541  ;;  %1651 = vrcp.f32 %v554_v42  ;;  %v847_v42 = vrot.slane %v846_v26, 1 }
 0x4d5   :  { %1653 = vrcp.f32 %v533_v38 }
 0x4d6   :  { %1655 = vrcp.f32 %v551_v41  ;;  %v848_v4 = vadd.f32 %v847_v42, %v846_v26  ;;  %v733_v26 = vunpack.c.l.bf16 %v1857_v45 }
 0x4d7   :  { %v1644_v13 = vpop.eup %1643  ;;  %1657 = vrcp.f32 %v536_v40 }
 0x4d8   :  { %v560_v57 = vpop.xlane.xlu0 %559  ;;  %1659 = vrcp.f32 %v542_v7  ;;  %v591_v8 = vmul.f32 %v1644_v13, %v2069_v14  ;;  %v862_v14 = vadd.f32 %v861_v28, %v860_v59  ;;  %v869_v7 = vrot.slane %v868_v35, 2  ;;  %v1581_v13 = vld [vmem:[%s2309_s6 + $0x8] sm:$0xff]  }
 0x4d9   :  { %v850_v11 = vmul.f32 0.125, %v848_v4 }
 0x4da   :  { %v863_v44 = vrot.slane %v862_v14, 1  ;;  %v870_v20 = vmax.f32 %v868_v35, %v869_v7  ;;  %v742_v35 = vunpack.c.h.bf16 %v1889_v54 }
 0x4db   :  { %v1646_v63 = vpop.eup %1645 }
 0x4dc   :  { %v566_v1 = vpop.xlane.xlu0 %565  ;;  %v563_v2 = vpop.xlane.xlu1 %562  ;;  %v592_v10 = vmul.f32 %v1646_v63, %v2080_v24  ;;  %v871_v21 = vrot.slane %v870_v20, 1 }
 0x4dd   :  { %1661 = vrcp.f32 %v566_v1  ;;  %v1648_v16 = vpop.eup %1647 }
 0x4de   :  { %1663 = vrcp.f32 %v563_v2  ;;  %v603_v17 = vpack.c.bf16 %v592_v10, %v591_v8  ;;  %v1650_v34 = vpop.eup %1649 }
 0x4df   :  { %1665 = vrcp.f32 %v560_v57  ;;  %v1652_v22 = vpop.eup %1651  ;;  %v586_v9 = vmul.f32 %v1650_v34, %v2037_v60  ;;  %v1580_v60 = vld [vmem:[%s2309_s6] sm:$0xff]  }
 0x4e0   :  { %1667 = vrcp.f32 %v539_v33  ;;  %1495 = vmatprep.mubr.msk.bf16.mxu1 %vm422_vm2, %v603_v17  ;;  %v557_v25 = vpop.xlane.xlu1 %556  ;;  %v1654_v29 = vpop.eup %1653  ;;  %v594_v38 = vmul.f32 %v1652_v22, %v2072_v49  ;;  %v585_v33 = vmul.f32 %v1648_v16, %v2028_v52  ;;  %v855_v49 = vmax.f32 %v853_v48, %v854_v3  ;;  %v1582_v22 = vld [vmem:[%s2308_s5] sm:$0xff]  }
 0x4e1   :  { %1669 = vrcp.f32 %v557_v25  ;;  %v1656_v24 = vpop.eup %1655  ;;  %v587_v41 = vmul.f32 %v1654_v29, %v2059_v30  ;;  %v1583_v25 = vld [vmem:[%s2308_s5 + $0x8] sm:$0xff]   ;;  %v741_v29 = vunpack.c.l.bf16 %v1889_v54  ;;  %v734_v3 = vunpack.c.h.bf16 %v1857_v45 }
 0x4e2   :  { %v1658_v37 = vpop.eup %1657  ;;  %v593_v43 = vmul.f32 %v1656_v24, %v2064_v62  ;;  %v600_v56 = vpack.c.bf16 %v586_v9, %v585_v33  ;;  %v856_v59 = vrot.slane %v855_v49, 1  ;;  %v739_v24 = vunpack.c.l.bf16 %v1879_v51 }
 0x4e3   :  { %v1660_v46 = vpop.eup %1659  ;;  %v588_v53 = vmul.f32 %v1658_v37, %v2049_v18  ;;  %v864_v18 = vadd.f32 %v863_v44, %v862_v14  ;;  %v731_v14 = vunpack.c.l.bf16 %v1846_v36 }
 0x4e4   :  { %v608_v40 = vpop.permute.xlu1 %607  ;;  %v604_v6 = vpack.c.bf16 %v594_v38, %v593_v43  ;;  %v590_v19 = vmul.f32 %v1660_v46, %v2084_v0  ;;  %v857_v48 = vmax.f32 %v855_v49, %v856_v59  ;;  %v732_v38 = vunpack.c.h.bf16 %v1846_v36 }
 0x4e5   :  { %1485 = vmatprep.subr.bf16.mxu0 %v608_v40  ;;  %1559 = vmatprep.subr.bf16.mxu1 %v608_v40  ;;  %v601_v62 = vpack.c.bf16 %v588_v53, %v587_v41  ;;  %v865_v16 = vmul.f32 0.125, %v864_v18  ;;  %v737_v36 = vunpack.c.l.bf16 %v1873_v50  ;;  %v743_v18 = vunpack.c.l.bf16 %v1895_v55 }
 0x4e6   :  { %1486 = vmatpush3.bf16.msra.mxu0 %v608_v40  ;;  %1560 = vmatpush3.bf16.msra.mxu1 %v608_v40  ;;  %v740_v40 = vunpack.c.h.bf16 %v1879_v51  ;;  %v745_v51 = vunpack.c.l.bf16 %v1905_v58 }
 0x4e7   :  { %v1662_v30 = vpop.eup %1661  ;;  %1511 = vmatprep.subr.bf16.mxu0 %v1732_v15  ;;  %1503 = vmatprep.subr.bf16.mxu1 %v1732_v15 }
 0x4e8   :  { %v1664_v52 = vpop.eup %1663  ;;  %v598_v2 = vmul.f32 %v1662_v30, %v2092_v5  ;;  %v874_v5 = vsel %vm873_vm3, %v850_v11, %v857_v48 }
 0x4e9   :  { %v1666_v57 = vpop.eup %1665  ;;  %1488 = vmatmul.mubr.msk.bf16.vlgmr.msra.gmra.mrb[4].mxu0 %vm422_vm2, %v600_v56  ;;  %1496 = vmatmul.mubr.msk.bf16.vlgmr.msra.gmra.mrb[16].mxu1 %vm422_vm2, %v604_v6  ;;  %v597_v1 = vmul.f32 %v1664_v52, %v2097_v39 }
 0x4ea   :  { %v1668_v61 = vpop.eup %1667  ;;  %1491 = vmatprep.mubr.msk.bf16.mxu0 %vm422_vm2, %v601_v62  ;;  %1512 = vmatpush3.bf16.msra.mxu0 %v1580_v60  ;;  %v596_v10 = vmul.f32 %v1666_v57, %v2088_v27  ;;  %v872_v27 = vmax.f32 %v870_v20, %v871_v21  ;;  %v735_v57 = vunpack.c.l.bf16 %v1864_v47 }
 0x4eb   :  { %v1670_v63 = vpop.eup %1669  ;;  %1513 = vmatprep.subr.bf16.mxu0 %v1732_v15  ;;  %v589_v28 = vmul.f32 %v1668_v61, %v2054_v23  ;;  %v606_v39 = vpack.c.bf16 %v598_v2, %v597_v1  ;;  %v876_v23 = vsel %vm875_vm4, %v874_v5, %v865_v16  ;;  %1504 = vmatpush3.bf16.msra.mxu1 %v1582_v22  ;;  %v738_v61 = vunpack.c.h.bf16 %v1873_v50 }
 0x4ec   :  { %v595_v8 = vmul.f32 %v1670_v63, %v2104_v12  ;;  %v878_v12 = vsel %vm877_vm5, %v876_v23, %v872_v27  ;;  %1505 = vmatprep.subr.bf16.mxu1 %v1732_v15  ;;  %v736_v63 = vunpack.c.h.bf16 %v1864_v47 }
 0x4ed   :  { %v602_v0 = vpack.c.bf16 %v590_v19, %v589_v28  ;;  %v879_v34 = vpack.c.bf16 %v878_v12, %v878_v12  ;;  %v744_v19 = vunpack.c.h.bf16 %v1895_v55 }
 0x4ee   :  { %v605_v17 = vpack.c.bf16 %v596_v10, %v595_v8  ;;  %1514 = vmatpush3.bf16.msra.mxu0 %v1581_v13  ;;  %v746_v13 = vunpack.c.h.bf16 %v1905_v58 }
 0x4ef   :  { %1525 = vmatprep.subr.bf16.mxu0 %v1732_v15  ;;  %1506 = vmatpush3.bf16.msra.mxu1 %v1583_v25 }
 0x4f0   :  { %1499 = vmatprep.mubr.msk.bf16.mxu1 %vm422_vm2, %v605_v17  ;;  %1519 = vmatprep.subr.bf16.mxu1 %v1732_v15 }
 0x4f1   :  { %1492 = vmatmul.mubr.msk.bf16.gmra.mrb[8].mxu0 %vm422_vm2, %v602_v0  ;;  %1500 = vmatmul.mubr.msk.bf16.gmra.mrb[20].mxu1 %vm422_vm2, %v606_v39 }
 0x4f2   :  { %1515 = vmatprep.mubr.msk.bf16.mxu0 %vm1733_vm1, %v1732_v15  ;;  %1507 = vmatprep.mubr.msk.bf16.mxu1 %vm1733_vm1, %v1732_v15 }
 0x4f9   :  { %1516 = vmatmul.mubr.msk.bf16.vlgmr.msra.gmra.mrb[12].mxu0 %vm69_vm0, %v879_v34 }
 0x4fa   :  { %1527 = vmatprep.mubr.msk.bf16.mxu0 %vm1733_vm1, %v1732_v15 }
 0x5bc   :  { %v1489_v37 = vpop.f32.mrb[4].mxu0  ;;  %v1497_v9 = vpop.f32.mrb[16].mxu1 }
 0x5bd   :  { %v749_v41 = vmul.f32 %v1489_v37, %v733_v26  ;;  %v757_v42 = vmul.f32 %v1497_v9, %v741_v29  ;;  %v668_v33 = vpop.f32.mrb[5].mxu0  ;;  %v700_v43 = vpop.f32.mrb[17].mxu1  ;;  %v1386_v29 = vld [vmem:[%s2313_s10 + $0x4] ss:$0 sm:$0xff] }
 0x5be   :  { %v747_v44 = vmul.f32 %v731_v14, %v668_v33  ;;  %v755_v46 = vmul.f32 %v739_v24, %v700_v43  ;;  %v1490_v53 = vpop.f32.mrb[6].mxu0  ;;  %v1498_v60 = vpop.f32.mrb[18].mxu1  ;;  %v945_v24 = vld [vmem:[%s2310_s7] sm:$0x3] }
 0x5bf   :  { %v750_v49 = vmul.f32 %v1490_v53, %v734_v3  ;;  %v758_v7 = vmul.f32 %v1498_v60, %v742_v35  ;;  %v671_v30 = vpop.f32.mrb[7].mxu0  ;;  %v703_v45 = vpop.f32.mrb[19].mxu1  ;;  %v1390_v53 = vld [vmem:[%s2313_s10 + $0x5] ss:$0 sm:$0xff] }
 0x5c0   :  { %v763_v6 = vadd.f32 %v749_v41, %v747_v44  ;;  %v767_v54 = vadd.f32 %v757_v42, %v755_v46  ;;  %v748_v56 = vmul.f32 %v732_v38, %v671_v30  ;;  %v756_v52 = vmul.f32 %v740_v40, %v703_v45 }
 0x5c1   :  { %v955_v40 = vsel %vm875_vm4, %v945_v24, 0 }
 0x5c2   :  { %v764_v62 = vadd.f32 %v750_v49, %v748_v56  ;;  %v768_v4 = vadd.f32 %v758_v7, %v756_v52 }
 0x5c4   :  { %v1493_v59 = vpop.f32.mrb[8].mxu0  ;;  %v1501_v20 = vpop.f32.mrb[20].mxu1 }
 0x5c5   :  { %v753_v1 = vmul.f32 %v1493_v59, %v737_v36  ;;  %v761_v2 = vmul.f32 %v1501_v20, %v745_v51  ;;  %v684_v8 = vpop.f32.mrb[9].mxu0  ;;  %v716_v10 = vpop.f32.mrb[21].mxu1 }
 0x5c6   :  { %v751_v11 = vmul.f32 %v735_v57, %v684_v8  ;;  %v759_v28 = vmul.f32 %v743_v18, %v716_v10  ;;  %v1494_v16 = vpop.f32.mrb[10].mxu0  ;;  %v1502_v17 = vpop.f32.mrb[22].mxu1  ;;  %v1073_v57 = vstv %s1395_s21  ;;  %v1382_v8 = vld [vmem:[%s2313_s10 + $0x3] ss:$0 sm:$0xff] }
 0x5c7   :  { %v754_v48 = vmul.f32 %v1494_v16, %v738_v61  ;;  %v762_v21 = vmul.f32 %v1502_v17, %v746_v13  ;;  %v687_v0 = vpop.f32.mrb[11].mxu0  ;;  %v719_v50 = vpop.f32.mrb[23].mxu1 }
 0x5c8   :  { %v765_v39 = vadd.f32 %v753_v1, %v751_v11  ;;  %v769_v58 = vadd.f32 %v761_v2, %v759_v28  ;;  %v752_v5 = vmul.f32 %v736_v63, %v687_v0  ;;  %v760_v23 = vmul.f32 %v744_v19, %v719_v50 }
 0x5c9   :  { %v1097_v0 = vstv %s1399_s24 }
 0x5ca   :  { %v771_v27 = vadd.f32 %v765_v39, %v763_v6  ;;  %v773_v47 = vadd.f32 %v769_v58, %v767_v54  ;;  %v766_v12 = vadd.f32 %v754_v48, %v752_v5  ;;  %v770_v55 = vadd.f32 %v762_v21, %v760_v23 }
 0x5cc   :  { %v775_v34 = vadd.f32 %v773_v47, %v771_v27  ;;  %v772_v22 = vadd.f32 %v766_v12, %v764_v62  ;;  %v774_v25 = vadd.f32 %v770_v55, %v768_v4  ;;  %v937_v26 = vpop.f32.mrb[12].mxu0  ;;  %v1584_v62 = vld [vmem:[%s2306_s3] sm:$0xff]   ;;  %v1069_v4 = vpop.xlane.xlu0 %1068  ;;  %s1090_s3 = sld [smem:[#allocation2]]  ;;  %v1103_v27 = vstv %s1400_s25 }
 0x5cd   :  { %v1517_v14 = vpop.f32.mrb[13].mxu0  ;;  %v938_v38 = vadd.f32 %v1386_v29, %v937_v26  ;;  %v1074_v61 = vadd.f32 %v1073_v57, %v1069_v4  ;;  %v1691_v47 = vld [vmem:[%s2303_s0] sm:$0xff]  ;;  %v1692_v26 = vld [vmem:[%s2303_s0 + $0x8] sm:$0xff]  ;;  %s1340_s0 = sshll.u32 %s1736_s28, 4  ;;  %s1341_s0 = int_to_ptr.vmem [resolvable:$true] %s1340_s0 }
 0x5ce   :  { %v776_v3 = vadd.f32 %v774_v25, %v772_v22  ;;  %v940_v35 = vpop.f32.mrb[14].mxu0  ;;  %s1705_s11 = scalar_lea.vmem %s1341_s0, 256  ;;  %p1710_p6 = scmp.lt.s32.totalorder %s1341_s0, %s1341_s0 }
 0x5cf   :  { %v1518_v37 = vpop.f32.mrb[15].mxu0  ;;  %v943_v41 = vmax.f32 %v938_v38, 0.0  ;;  %v1397_v59 = vmul.f32 -1.442695, %v1074_v61  ;;  %p1706_p5 = scmp.ne.s32.totalorder %s1341_s0, %s1705_s11  ;;  %p1711_p7 = scmp.lt.s32.totalorder %s1705_s11, %s1705_s11 }
 0x5d0   :  { %v777_v9 = vpack.c.bf16 %v776_v3, %v775_v34  ;;  %v1072_v18 = vpop.xlane.xlu0 %1071 }
 0x5d1   :  { %v944_v42 = vpack.c.bf16 %v943_v41, %v943_v41  ;;  %v1075_v13 = vadd.f32 %v1073_v57, %v1072_v18  ;;  %v1401_v18 = vld [vmem:[%s2313_s10 + $0x7] ss:$0 sm:$0xff]  ;;  %p1712_p8 = por %p1711_p7, %p1710_p6 }
 0x5d2   :  { %1508 = vmatmul.mubr.msk.bf16.vlgmr.msra.gmra.mrb[24].mxu1 %vm69_vm0, %v777_v9  ;;  %v1091_v11 = vstv %s1090_s3 }
 0x5d3   :  { %1520 = vmatpush3.bf16.msra.mxu1 %v955_v40  ;;  %1521 = vmatprep.mubr.msk.bf16.mxu1 %vm1733_vm1, %v1732_v15  ;;  %v1398_v20 = vmul.f32 -1.442695, %v1075_v13  ;;  %p1713_p9 = pnand %p1712_p8, %p1706_p5 }
 0x5d4   :  { %1531 = vmatprep.subr.bf16.mxu1 %v1732_v15 }
 0x5da   :  { %1522 = vmatmul.mubr.msk.bf16.vlgmr.msra.gmra.mrb[28].mxu1 %vm950_vm6, %v944_v42 }
 0x5db   :  { %1535 = vmatprep.mubr.msk.bf16.mxu1 %vm1733_vm1, %v1732_v15 }
 0x6a5   :  { %v835_v33 = vpop.f32.mrb[24].mxu1 }
 0x6a6   :  { %v1509_v43 = vpop.f32.mrb[25].mxu1  ;;  %v836_v10 = vadd.f32 %v1382_v8, %v835_v33 }
 0x6a7   :  { %v838_v44 = vpop.f32.mrb[26].mxu1 }
 0x6a8   :  { %v1510_v46 = vpop.f32.mrb[27].mxu1  ;;  %v839_v28 = vadd.f32 %v1382_v8, %v838_v44  ;;  %v1092_v17 = vmul.f32 %v1091_v11, %v836_v10  ;;  %v1589_v8 = vld [vmem:[%s2312_s9 + $0x10] sm:$0xff]   ;;  %v1590_v10 = vld [vmem:[%s2312_s9 + $0x18] sm:$0xff]  }
 0x6aa   :  { %v1093_v50 = vmul.f32 %v1091_v11, %v839_v28  ;;  %v1094_v12 = vadd.f32 %v1691_v47, %v1092_v17  ;;  %v1591_v11 = vld [vmem:[%s2312_s9 + $0x20] sm:$0xff]   ;;  %v1592_v28 = vld [vmem:[%s2312_s9 + $0x28] sm:$0xff]   ;;  %v1594_v17 = vld [vmem:[%s2312_s9 + $0x38] sm:$0xff]  }
 0x6ac   :  { %v1095_v29 = vadd.f32 %v1692_v26, %v1093_v50 }
 0x6ad   :  { %v991_v60 = vpop.f32.mrb[28].mxu1 }
 0x6ae   :  { %v992_v49 = vadd.f32 %v1390_v53, %v991_v60  ;;  %v1523_v7 = vpop.f32.mrb[29].mxu1 }
 0x6af   :  { %v994_v30 = vpop.f32.mrb[30].mxu1  ;;  %v1585_v7 = vld [vmem:[%s2311_s8] sm:$0xff]  }
 0x6b0   :  { %v1392_v45 = vmul.f32 -1.442695, %v992_v49  ;;  %v1524_v6 = vpop.f32.mrb[31].mxu1  ;;  %1532 = vmatpush3.bf16.msra.mxu1 %v1585_v7  ;;  %v1586_v30 = vld [vmem:[%s2311_s8 + $0x8] sm:$0xff]  }
 0x6b1   :  { %1533 = vmatprep.subr.bf16.mxu1 %v1732_v15  ;;  %v1588_v6 = vld [vmem:[%s2312_s9 + $0x8] sm:$0xff]  }
 0x6b2   :  { %1671 = vpow2.f32 %v1392_v45  ;;  %v1587_v45 = vld [vmem:[%s2312_s9] sm:$0xff]  }
 0x6b4   :  { %1534 = vmatpush3.bf16.msra.mxu1 %v1586_v30 }
 0x6bc   :  { %v1672_v54 = vpop.eup %1671 }
 0x6bd   :  { %v1000_v56 = vadd.f32 1.0, %v1672_v54 }
 0x6bf   :  { %1673 = vrcp.f32 %v1000_v56 }
 0x6c0   :  { %1675 = vpow2.f32 %v1397_v59 }
 0x6c1   :  { %1677 = vpow2.f32 %v1398_v20  ;;  %v1402_v20 = vld [vmem:[%s2313_s10 + $0x8] ss:$0 sm:$0xff] }
 0x6c9   :  { %v1674_v52 = vpop.eup %1673 }
 0x6ca   :  { %v1005_v36 = vpack.c.bf16 %v1674_v52, %v1674_v52  ;;  %v1676_v63 = vpop.eup %1675 }
 0x6cb   :  { %v1678_v19 = vpop.eup %1677  ;;  %v1082_v1 = vadd.f32 1.0, %v1676_v63 }
 0x6cc   :  { %v1015_v51 = vsel %vm875_vm4, %v1005_v36, 0  ;;  %v1083_v2 = vadd.f32 1.0, %v1678_v19 }
 0x6cd   :  { %1526 = vmatpush3.bf16.msra.mxu0 %v1015_v51  ;;  %1679 = vrcp.f32 %v1082_v1 }
 0x6ce   :  { %1539 = vmatprep.subr.bf16.mxu0 %v1732_v15  ;;  %1681 = vrcp.f32 %v1083_v2 }
 0x6d0   :  { %1528 = vmatmul.mubr.msk.bf16.vlgmr.msra.gmra.mrb[16].mxu0 %vm950_vm6, %v1584_v62 }
 0x6d1   :  { %1555 = vmatprep.mubr.msk.bf16.mxu0 %vm1733_vm1, %v1732_v15  ;;  %1540 = vmatpush3.bf16.msra.mxu0 %v1587_v45 }
 0x6d2   :  { %1541 = vmatprep.subr.bf16.mxu0 %v1732_v15 }
 0x6d5   :  { %1542 = vmatpush3.bf16.msra.mxu0 %v1588_v6 }
 0x6d6   :  { %1543 = vmatprep.subr.bf16.mxu0 %v1732_v15 }
 0x6d7   :  { %v1680_v16 = vpop.eup %1679 }
 0x6d8   :  { %v1682_v48 = vpop.eup %1681  ;;  %v1088_v5 = vmul.f32 %v1680_v16, %v1833_v31  ;;  %v1593_v16 = vld [vmem:[%s2312_s9 + $0x30] sm:$0xff]  }
 0x6d9   :  { %v1089_v22 = vmul.f32 %v1682_v48, %v1835_v32  ;;  %1544 = vmatpush3.bf16.msra.mxu0 %v1589_v8  ;;  %v1403_v48 = vld [vmem:[%s2313_s10 + $0x9] ss:$0 sm:$0xff] }
 0x6da   :  { %v1104_v24 = vmul.f32 %v1103_v27, %v1088_v5  ;;  %1545 = vmatprep.subr.bf16.mxu0 %v1732_v15 }
 0x6db   :  { %v1105_v37 = vmul.f32 %v1103_v27, %v1089_v22 }
 0x6dd   :  { %1546 = vmatpush3.bf16.msra.mxu0 %v1590_v10 }
 0x6de   :  { %1547 = vmatprep.subr.bf16.mxu0 %v1732_v15 }
 0x6e1   :  { %1548 = vmatpush3.bf16.msra.mxu0 %v1591_v11 }
 0x6e2   :  { %1549 = vmatprep.subr.bf16.mxu0 %v1732_v15 }
 0x6e5   :  { %1550 = vmatpush3.bf16.msra.mxu0 %v1592_v28 }
 0x6e6   :  { %1551 = vmatprep.subr.bf16.mxu0 %v1732_v15 }
 0x6e9   :  { %1552 = vmatpush3.bf16.msra.mxu0 %v1593_v16 }
 0x6ea   :  { %1553 = vmatprep.subr.bf16.mxu0 %v1732_v15 }
 0x6ed   :  { %1554 = vmatpush3.bf16.msra.mxu0 %v1594_v17 }
 0x7a3   :  { %v1051_v21 = vpop.f32.mrb[16].mxu0 }
 0x7a4   :  { %v1058_v39 = vmul.f32 %v1051_v21, %v1833_v31  ;;  %v1529_v58 = vpop.f32.mrb[17].mxu0 }
 0x7a5   :  { %v1054_v23 = vpop.f32.mrb[18].mxu0 }
 0x7a6   :  { %v1098_v55 = vmul.f32 %v1097_v0, %v1058_v39  ;;  %v1059_v34 = vmul.f32 %v1054_v23, %v1835_v32  ;;  %v1530_v25 = vpop.f32.mrb[19].mxu0 }
 0x7a8   :  { %v1100_v14 = vadd.f32 %v1098_v55, %v1094_v12  ;;  %v1099_v31 = vmul.f32 %v1097_v0, %v1059_v34 }
 0x7aa   :  { %v1101_v3 = vadd.f32 %v1099_v31, %v1095_v29  ;;  %v2224_v35 = vadd.f32 %v1104_v24, %v1100_v14  ;;  %v1407_v14 = vld [vmem:[%s2313_s10 + $0xa] ss:$0 sm:$0xff] }
 0x7ac   :  { %v1108_v9 = vsel %vm69_vm0, %v2224_v35, 0.0  ;;  %v2228_v38 = vadd.f32 %v1105_v37, %v1101_v3 }
 0x7ad   :  { %1109 = vadd.xlane.f32.xlu0 %v1108_v9 }
 0x7ae   :  { %v1111_v32 = vsel %vm69_vm0, %v2228_v38, 0.0 }
 0x7b1   :  { %1112 = vadd.xlane.f32.xlu0 %v1111_v32 }
 0x83a   :  { %v1110_v40 = vpop.xlane.xlu0 %1109 }
 0x83b   :  { %v1114_v41 = vmul.f32 0.03125, %v1110_v40 }
 0x83d   :  { %v1116_v42 = vsub.f32 %v2224_v35, %v1114_v41 }
 0x83e   :  { %v1113_v33 = vpop.xlane.xlu0 %1112 }
 0x83f   :  { %v1115_v43 = vmul.f32 0.03125, %v1113_v33  ;;  %v1118_v44 = vmul.f32 %v1116_v42, %v1116_v42 }
 0x841   :  { %v1117_v46 = vsub.f32 %v2228_v38, %v1115_v43  ;;  %v1120_v53 = vsel %vm69_vm0, %v1118_v44, 0.0 }
 0x842   :  { %1121 = vadd.xlane.f32.xlu0 %v1120_v53 }
 0x843   :  { %v1119_v60 = vmul.f32 %v1117_v46, %v1117_v46 }
 0x845   :  { %v1123_v49 = vsel %vm69_vm0, %v1119_v60, 0.0 }
 0x846   :  { %1124 = vadd.xlane.f32.xlu1 %v1123_v49 }
 0x8cf   :  { %v1122_v54 = vpop.xlane.xlu0 %1121 }
 0x8d0   :  { %v1126_v56 = vmul.f32 0.03125, %v1122_v54 }
 0x8d2   :  { %v1128_v52 = vadd.f32 1e-05, %v1126_v56 }
 0x8d3   :  { %v1125_v36 = vpop.xlane.xlu1 %1124 }
 0x8d4   :  { %1683 = vrsqrt.f32 %v1128_v52  ;;  %v1127_v51 = vmul.f32 0.03125, %v1125_v36 }
 0x8d6   :  { %v1129_v62 = vadd.f32 1e-05, %v1127_v51 }
 0x8d8   :  { %1685 = vrsqrt.f32 %v1129_v62 }
 0x8de   :  { %v1684_v4 = vpop.eup %1683 }
 0x8df   :  { %v1132_v57 = vmul.f32 %v1684_v4, %v1116_v42 }
 0x8e1   :  { %v1138_v13 = vmul.f32 %v1401_v18, %v1132_v57 }
 0x8e2   :  { %v1686_v61 = vpop.eup %1685 }
 0x8e3   :  { %v1133_v59 = vmul.f32 %v1686_v61, %v1117_v46  ;;  %v1144_v19 = vadd.f32 %v1402_v20, %v1138_v13 }
 0x8e5   :  { %v1139_v63 = vmul.f32 %v1401_v18, %v1133_v59 }
 0x8e7   :  { %v1145_v1 = vadd.f32 %v1402_v20, %v1139_v63 }
 0x8e9   :  { %v1146_v2 = vpack.c.bf16 %v1145_v1, %v1144_v19 }
 0x8eb   :  { %1536 = vmatmul.mubr.msk.bf16.vlgmr.msra.gmra.mrb[32].mxu1 %vm69_vm0, %v1146_v2 }
 0x9be   :  { %v1204_v21 = vpop.f32.mrb[32].mxu1 }
 0x9bf   :  { %v1205_v0 = vadd.f32 %v1403_v48, %v1204_v21  ;;  %v1537_v50 = vpop.f32.mrb[33].mxu1 }
 0x9c0   :  { %v1207_v39 = vpop.f32.mrb[34].mxu1 }
 0x9c1   :  { %v1213_v58 = vmul.f32 0.70710677, %v1205_v0  ;;  %v1208_v5 = vadd.f32 %v1403_v48, %v1207_v39  ;;  %v1538_v23 = vpop.f32.mrb[35].mxu1  ;;  %v1211_v55 = vmul.f32 0.5, %v1205_v0 }
 0x9c3   :  { %1687 = verf.f32 %v1213_v58  ;;  %v1214_v27 = vmul.f32 0.70710677, %v1208_v5  ;;  %v1212_v34 = vmul.f32 0.5, %v1208_v5 }
 0x9c5   :  { %1689 = verf.f32 %v1214_v27 }
 0x9cd   :  { %v1688_v15 = vpop.eup %1687 }
 0x9ce   :  { %v1217_v47 = vadd.f32 1.0, %v1688_v15 }
 0x9cf   :  { %v1690_v12 = vpop.eup %1689 }
 0x9d0   :  { %v1218_v22 = vadd.f32 1.0, %v1690_v12  ;;  %v1219_v25 = vmul.f32 %v1217_v47, %v1211_v55 }
 0x9d2   :  { %v1220_v26 = vmul.f32 %v1218_v22, %v1212_v34 }
 0x9d4   :  { %v1221_v29 = vpack.c.bf16 %v1220_v26, %v1219_v25 }
 0x9d6   :  { %1556 = vmatmul.mubr.bf16.vlgmr.msra.gmra.mrb[20].mxu0 %v1221_v29 }
 0xaa9   :  { %v1324_v31 = vpop.f32.mrb[20].mxu0 }
 0xaaa   :  { %v1325_v24 = vadd.f32 %v1407_v14, %v1324_v31  ;;  %v1557_v3 = vpop.f32.mrb[21].mxu0 }
 0xaab   :  { %v1327_v37 = vpop.f32.mrb[22].mxu0 }
 0xaac   :  { %v1331_v9 = vadd.f32 %v1325_v24, %v2224_v35  ;;  %v1328_v32 = vadd.f32 %v1407_v14, %v1327_v37  ;;  %v1558_v40 = vpop.f32.mrb[23].mxu0 }
 0xaae   :  { %1333 = vst.msk [vmem:[#allocation5] sm:$0xff] %vm69_vm0, %v1331_v9  ;;  %v1332_v41 = vadd.f32 %v1328_v32, %v2228_v38 }
 0xab0   :  { %1334 = vst.msk [vmem:[#allocation5 + $0x8] sm:$0xff] %vm69_vm0, %v1332_v41 }
 0xab1   :  { %1716 = shalt.err (!%p1713_p9)
}
 0xab2   :  { %s1717_s30 = scalar_lea.hbm %s2315_s12, 256 }
 0xab3   :  { %p1718_p10 = scmp.ne.s32.totalorder %s2315_s12, %s1717_s30  ;;  %p1721_p11 = scmp.lt.u32.totalorder %s1717_s30, %s2315_s12 }
 0xab5   :  { %p1723_p12 = pnand %p1721_p11, %p1718_p10 }
 0xab7   :  { %1726 = shalt.err (!%p1723_p12)
}
 0xab8   :  { %s1737_s8 = smov 128   ;;  %s1738_s16 = smov 8  }
 0xab9   :  { %1346 = dma.vmem_to_hbm [thread:$0]  %s1341_s0, 256, %s2315_s12, [#allocation3], %s1737_s8, %s1737_s8, %s1738_s16  }
 0xaba   :  { %1729 = dma.done.wait [#allocation3], 256  }
 0xabb   :  { %1730 = vsyncadd [#allocation3], 4294967040 }
 0xabc   :  { %1350 = vsyncpa [#allocation3], 1 }
 0xabd   :  { %1351 = vsyncpa [#allocation4], 1 }

</bundles_post_ra>
